<compile_context>
chip_gen: v6e
topology: v6e:2x2x1
jax: 0.10.0
libtpu: 0.0.40
codegen_flags: <defaults>
</compile_context>

<pallas_src>
import functools

import jax
import jax.numpy as jnp
from jax.experimental import pallas as pl
from jax.experimental.pallas import tpu as pltpu


# ----------------------------------------------------------------------------
# Model configuration (static)
# ----------------------------------------------------------------------------
NUM_LAYERS_IMG = 5      # cfg.dataset.num_layers_img
FILTER_DIM_IMG = 8      # cfg.dataset.filter_dim_img
IMG_CHANNELS = 3
IMG_SIZE = 64
NUM_ATTR = 40
A_VAL, B_VAL = 2.0, 0.3

_D = FILTER_DIM_IMG
CONV1_CFG = dict(k=3, stride=2, padding=2, cout=_D)
# residual blocks: (cin, cout, k, stride, padding)
BLOCK_CFG = [
    (1 * _D, 2 * _D, 4, 2, 1),
    (2 * _D, 3 * _D, 4, 2, 1),
    (3 * _D, 4 * _D, 4, 2, 1),
    (4 * _D, 5 * _D, 4, 2, 0),
]

MAX_TILE_M = 2048   # lane-axis tile cap (VMEM per tile stays ~1 MiB even for block 1)


def _round_up(x, m):
    return (x + m - 1) // m * m


def _cdiv(a, b):
    return -(-a // b)


def _m_tiling(M):
    """Pad the pixel (lane) axis to a multiple of 128 and pick an even tile."""
    Mp = _round_up(M, 128)
    if Mp <= MAX_TILE_M:
        return Mp, Mp
    n = _cdiv(Mp, MAX_TILE_M)
    tile = _round_up(_cdiv(Mp, n), 128)
    return tile * n, tile


# ----------------------------------------------------------------------------
# Pallas kernels
# ----------------------------------------------------------------------------
def _conv_act_kernel(p_ref, wf_ref, wa_ref, h_ref, y_ref):
    """Fused conv GEMM + next block's 1x1 conv + ReLU on a (K, TM) patch tile.

    h = W_f @ patches                       # this layer's output (a/b folded in W_f)
    y = relu(W_a_next @ h)                  # next block's 1x1-conv branch input
    """
    h = jnp.dot(wf_ref[...], p_ref[...], preferred_element_type=jnp.float32)
    h_ref[...] = h.astype(h_ref.dtype)
    y = jnp.dot(wa_ref[...], h.astype(jnp.bfloat16),
                preferred_element_type=jnp.float32)
    y_ref[...] = jnp.maximum(y, 0.0).astype(y_ref.dtype)


def _head_kernel(p_ref, wf_ref, lw_ref, lb_ref, o_ref):
    """Last residual block (single fused GEMM) + flatten + Linear(40->40) + Sigmoid."""
    feat = jnp.dot(wf_ref[...], p_ref[...], preferred_element_type=jnp.float32)
    # TODO(synk): Dropout(p=0.5) is eval-mode identity here (no RNG mask).
    logits = jnp.dot(lw_ref[...], feat.astype(jnp.bfloat16),
                     preferred_element_type=jnp.float32) + lb_ref[...]
    o_ref[...] = 1.0 / (1.0 + jnp.exp(-logits))                    # (40, N) f32


# ----------------------------------------------------------------------------
# pallas_call wrappers
# ----------------------------------------------------------------------------
def conv_block_gemm(wf, wa_next, pt):
    """pt (K, M) bf16 -> (h (Cout, M), y (Cnext, M)) bf16, tiled over M.

    h = wf @ pt ; y = relu(wa_next @ h).  Weights stay resident across tiles.
    """
    cout, K = wf.shape
    cnext = wa_next.shape[0]
    _, M = pt.shape
    Mp, TM = _m_tiling(M)
    if Mp != M:
        pt = jnp.pad(pt, ((0, 0), (0, Mp - M)))
    h, y = pl.pallas_call(
        _conv_act_kernel,
        out_shape=(jax.ShapeDtypeStruct((cout, Mp), jnp.bfloat16),
                   jax.ShapeDtypeStruct((cnext, Mp), jnp.bfloat16)),
        grid=(Mp // TM,),
        in_specs=[
            pl.BlockSpec((K, TM), lambda i: (0, i)),
            pl.BlockSpec((cout, K), lambda i: (0, 0)),     # fused [a*Ws | b*Wb], resident
            pl.BlockSpec((cnext, cout), lambda i: (0, 0)),  # next-block 1x1, resident
        ],
        out_specs=(pl.BlockSpec((cout, TM), lambda i: (0, i)),
                   pl.BlockSpec((cnext, TM), lambda i: (0, i))),
        compiler_params=pltpu.CompilerParams(dimension_semantics=("parallel",)),
    )(pt.astype(jnp.bfloat16), wf, wa_next)
    return h[:, :M], y[:, :M]


def fused_head(wf, lin_w, lin_b, pt):
    """Last block GEMM + Linear + Sigmoid: pt (K, N) -> (40, N) f32."""
    K, M = pt.shape            # M == batch size (1x1 spatial output)
    cout = wf.shape[0]
    return pl.pallas_call(
        _head_kernel,
        out_shape=jax.ShapeDtypeStruct((NUM_ATTR, M), jnp.float32),
        grid=(1,),
        in_specs=[
            pl.BlockSpec((K, M), lambda i: (0, 0)),
            pl.BlockSpec((cout, K), lambda i: (0, 0)),
            pl.BlockSpec((NUM_ATTR, cout), lambda i: (0, 0)),
            pl.BlockSpec((NUM_ATTR, 1), lambda i: (0, 0)),
        ],
        out_specs=pl.BlockSpec((NUM_ATTR, M), lambda i: (0, 0)),
    )(pt.astype(jnp.bfloat16), wf, lin_w, lin_b)


# ----------------------------------------------------------------------------
# im2col (plain-JAX glue, channels-first / transposed layout, stays in bf16:
# column axis = N*OH*OW output pixels; feature order (kh, kw, channel))
# ----------------------------------------------------------------------------
def _im2col_t(h, k, stride, padding):
    """h: (C, N, H, W) -> patches^T (k*k*C, N*OH*OW)."""
    C, N, H, W = h.shape
    if padding:
        h = jnp.pad(h, ((0, 0), (0, 0), (padding, padding), (padding, padding)))
    Hp, Wp = H + 2 * padding, W + 2 * padding
    OH = (Hp - k) // stride + 1
    OW = (Wp - k) // stride + 1
    rows = []
    for kh in range(k):
        for kw in range(k):
            rows.append(h[:, :,
                          kh:kh + (OH - 1) * stride + 1:stride,
                          kw:kw + (OW - 1) * stride + 1:stride])   # (C, N, OH, OW)
    pt = jnp.concatenate(rows, axis=0)                             # (k*k*C, N, OH, OW)
    return pt.reshape(k * k * C, N * OH * OW), OH, OW


# ----------------------------------------------------------------------------
# Parameters
# ----------------------------------------------------------------------------
def _init_conv(key, cout, cin, kh, kw, scale=0.05):
    return scale * jax.random.normal(key, (cout, cin, kh, kw), jnp.float32)


def init_params(key):
    """Raw parameters in PyTorch layout (Cout, Cin, KH, KW)."""
    keys = jax.random.split(key, 16)
    params = {"conv1_w": _init_conv(keys[0], _D, IMG_CHANNELS, 3, 3)}
    params["blocks"] = []
    ki = 1
    for (cin, cout, k, s, p) in BLOCK_CFG:
        params["blocks"].append({
            "conv_a_w": _init_conv(keys[ki + 0], cin, cin, 1, 1),   # 1x1 branch entry
            "conv_b_w": _init_conv(keys[ki + 1], cout, cin, k, k),  # strided branch
            "conv_s_w": _init_conv(keys[ki + 2], cout, cin, k, k),  # strided shortcut
        })
        ki += 3
    feat = NUM_LAYERS_IMG * FILTER_DIM_IMG
    params["lin_w"] = 0.05 * jax.random.normal(keys[13], (NUM_ATTR, feat), jnp.float32)
    params["lin_b"] = 0.01 * jax.random.normal(keys[14], (NUM_ATTR,), jnp.float32)
    return params


def pack_params(params):
    """Pre-pack conv weights into GEMM-ready bf16 matrices (paid once, offline)."""
    packed = {}
    k = CONV1_CFG["k"]
    K1 = k * k * IMG_CHANNELS
    K1p = _round_up(K1, 8)                                  # align contraction dim once
    w1m = params["conv1_w"].transpose(0, 2, 3, 1).reshape(_D, K1)
    packed["conv1_w"] = jnp.pad(w1m, ((0, 0), (0, K1p - K1))).astype(jnp.bfloat16)

    packed["wa"] = []   # per-block 1x1 conv weights (cin, cin)
    packed["wf"] = []   # per-block fused [a*W_s | b*W_b] over channel-stacked patches
    for (cin, cout, kk, s, p), blk in zip(BLOCK_CFG, params["blocks"]):
        packed["wa"].append(blk["conv_a_w"].reshape(cin, cin).astype(jnp.bfloat16))
        # channel-stacked input is concat([h, y]); fold a/b merge factors offline.
        wsb = jnp.concatenate([A_VAL * blk["conv_s_w"],
                               B_VAL * blk["conv_b_w"]], axis=1)     # (cout, 2cin, k, k)
        wf = wsb.transpose(0, 2, 3, 1).reshape(cout, kk * kk * 2 * cin)
        packed["wf"].append(wf.astype(jnp.bfloat16))
    packed["lin_w"] = params["lin_w"].astype(jnp.bfloat16)           # (40, 5D)
    packed["lin_b"] = params["lin_b"].reshape(NUM_ATTR, 1).astype(jnp.float32)
    return packed


# ----------------------------------------------------------------------------
# Forward
# ----------------------------------------------------------------------------
def clf_img_forward(packed, x_img):
    """x_img: (N, 3, 64, 64) NCHW -> (N, 40) sigmoid attribute scores."""
    x = jnp.transpose(x_img, (1, 0, 2, 3)).astype(jnp.bfloat16)   # (C, N, H, W), once
    n = x.shape[1]

    # conv1 (3 -> D, k3 s2 p2, bias-free) + block1's 1x1 conv + ReLU in the epilogue
    pt, OH, OW = _im2col_t(x, CONV1_CFG["k"], CONV1_CFG["stride"],
                           CONV1_CFG["padding"])
    Kp = packed["conv1_w"].shape[1]
    pt = jnp.pad(pt, ((0, Kp - pt.shape[0]), (0, 0)))
    h, y = conv_block_gemm(packed["conv1_w"], packed["wa"][0], pt)
    c = CONV1_CFG["cout"]
    h = h.reshape(c, n, OH, OW)
    y = y.reshape(c, n, OH, OW)

    # residual downsample blocks 1..3: one fused GEMM over channel-stacked (h, y)
    # patches, plus the next block's 1x1 conv + ReLU in the epilogue.
    for bi, (cin, cout, kk, s, p) in enumerate(BLOCK_CFG[:-1]):
        hy = jnp.concatenate([h, y], axis=0)                     # (2*cin, N, H, W)
        pt, OH, OW = _im2col_t(hy, kk, s, p)                     # (kk*kk*2*cin, M)
        h, y = conv_block_gemm(packed["wf"][bi], packed["wa"][bi + 1], pt)
        h = h.reshape(cout, n, OH, OW)
        y = y.reshape(cout, n, OH, OW)

    # block 4 fused with flatten + Linear(5D -> 40) + Sigmoid head
    _, cout, kk, s, p = BLOCK_CFG[-1]
    hy = jnp.concatenate([h, y], axis=0)
    pt, _, _ = _im2col_t(hy, kk, s, p)                           # (1024, N), 1x1 spatial
    out_t = fused_head(packed["wf"][-1], packed["lin_w"], packed["lin_b"], pt)
    return out_t.T                                               # (N, 40)


# ----------------------------------------------------------------------------
# Pure-JAX f32 reference (correctness check only)
# ----------------------------------------------------------------------------
def _ref_forward(params, x_img):
    conv = lambda x, w, s, p: jax.lax.conv_general_dilated(
        x, w, window_strides=(s, s), padding=[(p, p), (p, p)],
        dimension_numbers=("NCHW", "OIHW", "NCHW"))
    h = conv(x_img.astype(jnp.float32), params["conv1_w"],
             CONV1_CFG["stride"], CONV1_CFG["padding"])
    for (cin, cout, k, s, p), blk in zip(BLOCK_CFG, params["blocks"]):
        branch = conv(jax.nn.relu(conv(h, blk["conv_a_w"], 1, 0)), blk["conv_b_w"], s, p)
        shortcut = conv(h, blk["conv_s_w"], s, p)
        h = A_VAL * shortcut + B_VAL * branch
    feat = h.reshape(h.shape[0], -1)
    logits = feat @ params["lin_w"].T + params["lin_b"]
    return jax.nn.sigmoid(logits)


if __name__ == "__main__":
    key = jax.random.PRNGKey(0)
    pkey, xkey = jax.random.split(key)
    params = init_params(pkey)
    packed = pack_params(params)
    x_img = jax.random.normal(xkey, (2, IMG_CHANNELS, IMG_SIZE, IMG_SIZE), jnp.float32)

    fwd = jax.jit(clf_img_forward)
    out = jax.block_until_ready(fwd(packed, x_img))

    assert out.shape == (2, NUM_ATTR), out.shape
    assert out.dtype == jnp.float32
    assert bool(jnp.all((out >= 0.0) & (out <= 1.0)))

    ref = _ref_forward(params, x_img)
    max_err = float(jnp.max(jnp.abs(out - ref)))
    assert max_err < 3e-2, f"max abs diff vs reference: {max_err}"
    print("KERNEL_OK")
</pallas_src>

<mosaic_0001>
module attributes {stable_mosaic.version = 11 : i64} {
  func.func @_conv_act_kernel(%arg0: i32, %arg1: memref<32x1152xbf16, #tpu.memory_space<vmem>>, %arg2: memref<8x32xbf16, #tpu.memory_space<vmem>>, %arg3: memref<8x8xbf16, #tpu.memory_space<vmem>>, %arg4: memref<8x1152xbf16, #tpu.memory_space<vmem>>, %arg5: memref<8x1152xbf16, #tpu.memory_space<vmem>>) attributes {dimension_semantics = [#tpu.dimension_semantics<parallel>], iteration_bounds = array<i64: 2>, scalar_prefetch = 0 : i64, scratch_operands = 0 : i64, tpu.core_type = #tpu.core_type<tc>, window_params = [{transform_indices = @transform_0, window_bounds = array<i64: 32, 1152>}, {pipeline_mode = #tpu.pipeline_mode<synchronous>, transform_indices = @transform_1, window_bounds = array<i64: 8, 32>}, {pipeline_mode = #tpu.pipeline_mode<synchronous>, transform_indices = @transform_2, window_bounds = array<i64: 8, 8>}, {transform_indices = @transform_3, window_bounds = array<i64: 8, 1152>}, {transform_indices = @transform_4, window_bounds = array<i64: 8, 1152>}]} {
    %c0 = arith.constant 0 : index
    %c0_0 = arith.constant 0 : index
    %0 = vector.load %arg2[%c0, %c0_0] : memref<8x32xbf16, #tpu.memory_space<vmem>>, vector<8x32xbf16>
    %c0_1 = arith.constant 0 : index
    %c0_2 = arith.constant 0 : index
    %1 = vector.load %arg1[%c0_1, %c0_2] : memref<32x1152xbf16, #tpu.memory_space<vmem>>, vector<32x1152xbf16>
    %cst = arith.constant dense<0.000000e+00> : vector<8x1152xf32>
    %2 = tpu.matmul %0, %1, %cst {dimension_numbers = #tpu.dot_dimension_numbers<[1], [0], [0], [1], [0, 0, 1, 1], [], []>} : vector<8x32xbf16>, vector<32x1152xbf16>, vector<8x1152xf32> -> vector<8x1152xf32>
    %3 = arith.truncf %2 : vector<8x1152xf32> to vector<8x1152xbf16>
    %c0_3 = arith.constant 0 : index
    %c0_4 = arith.constant 0 : index
    %4 = vector.load %arg4[%c0_3, %c0_4] : memref<8x1152xbf16, #tpu.memory_space<vmem>>, vector<8x1152xbf16>
    tpu.vector_store %arg4[%c0_3, %c0_4], %3 {strides = array<i32>} : memref<8x1152xbf16, #tpu.memory_space<vmem>>, vector<8x1152xbf16>,
    %c0_5 = arith.constant 0 : index
    %c0_6 = arith.constant 0 : index
    %5 = vector.load %arg3[%c0_5, %c0_6] : memref<8x8xbf16, #tpu.memory_space<vmem>>, vector<8x8xbf16>
    %6 = arith.truncf %2 : vector<8x1152xf32> to vector<8x1152xbf16>
    %cst_7 = arith.constant dense<0.000000e+00> : vector<8x1152xf32>
    %7 = tpu.matmul %5, %6, %cst_7 {dimension_numbers = #tpu.dot_dimension_numbers<[1], [0], [0], [1], [0, 0, 1, 1], [], []>} : vector<8x8xbf16>, vector<8x1152xbf16>, vector<8x1152xf32> -> vector<8x1152xf32>
    %cst_8 = arith.constant 0.000000e+00 : f32
    %8 = vector.broadcast %cst_8 : f32 to vector<8x1152xf32>
    %9 = arith.maximumf %7, %8 : vector<8x1152xf32>
    %10 = arith.truncf %9 : vector<8x1152xf32> to vector<8x1152xbf16>
    %c0_9 = arith.constant 0 : index
    %c0_10 = arith.constant 0 : index
    %11 = vector.load %arg5[%c0_9, %c0_10] : memref<8x1152xbf16, #tpu.memory_space<vmem>>, vector<8x1152xbf16>
    tpu.vector_store %arg5[%c0_9, %c0_10], %10 {strides = array<i32>} : memref<8x1152xbf16, #tpu.memory_space<vmem>>, vector<8x1152xbf16>,
    return
  }
  func.func @transform_0(%arg0: i32) -> (i32, i32) {
    %c0_i32 = arith.constant 0 : i32
    %c0_i32_0 = arith.constant 0 : i32
    return %c0_i32, %arg0 : i32, i32
  }
  func.func @transform_1(%arg0: i32) -> (i32, i32) {
    %c0_i32 = arith.constant 0 : i32
    %c0_i32_0 = arith.constant 0 : i32
    %c0_i32_1 = arith.constant 0 : i32
    return %c0_i32, %c0_i32_0 : i32, i32
  }
  func.func @transform_2(%arg0: i32) -> (i32, i32) {
    %c0_i32 = arith.constant 0 : i32
    %c0_i32_0 = arith.constant 0 : i32
    %c0_i32_1 = arith.constant 0 : i32
    return %c0_i32, %c0_i32_0 : i32, i32
  }
  func.func @transform_3(%arg0: i32) -> (i32, i32) {
    %c0_i32 = arith.constant 0 : i32
    %c0_i32_0 = arith.constant 0 : i32
    return %c0_i32, %arg0 : i32, i32
  }
  func.func @transform_4(%arg0: i32) -> (i32, i32) {
    %c0_i32 = arith.constant 0 : i32
    %c0_i32_0 = arith.constant 0 : i32
    return %c0_i32, %arg0 : i32, i32
  }
}

module attributes {stable_mosaic.version = 11 : i64} {
  func.func @_conv_act_kernel(%arg0: i32, %arg1: memref<256x512xbf16, #tpu.memory_space<vmem>>, %arg2: memref<16x256xbf16, #tpu.memory_space<vmem>>, %arg3: memref<16x16xbf16, #tpu.memory_space<vmem>>, %arg4: memref<16x512xbf16, #tpu.memory_space<vmem>>, %arg5: memref<16x512xbf16, #tpu.memory_space<vmem>>) attributes {dimension_semantics = [#tpu.dimension_semantics<parallel>], iteration_bounds = array<i64: 1>, scalar_prefetch = 0 : i64, scratch_operands = 0 : i64, tpu.core_type = #tpu.core_type<tc>, window_params = [{transform_indices = @transform_0, window_bounds = array<i64: 256, 512>}, {pipeline_mode = #tpu.pipeline_mode<synchronous>, transform_indices = @transform_1, window_bounds = array<i64: 16, 256>}, {pipeline_mode = #tpu.pipeline_mode<synchronous>, transform_indices = @transform_2, window_bounds = array<i64: 16, 16>}, {transform_indices = @transform_3, window_bounds = array<i64: 16, 512>}, {transform_indices = @transform_4, window_bounds = array<i64: 16, 512>}]} {
    %c0 = arith.constant 0 : index
    %c0_0 = arith.constant 0 : index
    %0 = vector.load %arg2[%c0, %c0_0] : memref<16x256xbf16, #tpu.memory_space<vmem>>, vector<16x256xbf16>
    %c0_1 = arith.constant 0 : index
    %c0_2 = arith.constant 0 : index
    %1 = vector.load %arg1[%c0_1, %c0_2] : memref<256x512xbf16, #tpu.memory_space<vmem>>, vector<256x512xbf16>
    %cst = arith.constant dense<0.000000e+00> : vector<16x512xf32>
    %2 = tpu.matmul %0, %1, %cst {dimension_numbers = #tpu.dot_dimension_numbers<[1], [0], [0], [1], [0, 0, 1, 1], [], []>} : vector<16x256xbf16>, vector<256x512xbf16>, vector<16x512xf32> -> vector<16x512xf32>
    %3 = arith.truncf %2 : vector<16x512xf32> to vector<16x512xbf16>
    %c0_3 = arith.constant 0 : index
    %c0_4 = arith.constant 0 : index
    %4 = vector.load %arg4[%c0_3, %c0_4] : memref<16x512xbf16, #tpu.memory_space<vmem>>, vector<16x512xbf16>
    tpu.vector_store %arg4[%c0_3, %c0_4], %3 {strides = array<i32>} : memref<16x512xbf16, #tpu.memory_space<vmem>>, vector<16x512xbf16>,
    %c0_5 = arith.constant 0 : index
    %c0_6 = arith.constant 0 : index
    %5 = vector.load %arg3[%c0_5, %c0_6] : memref<16x16xbf16, #tpu.memory_space<vmem>>, vector<16x16xbf16>
    %6 = arith.truncf %2 : vector<16x512xf32> to vector<16x512xbf16>
    %cst_7 = arith.constant dense<0.000000e+00> : vector<16x512xf32>
    %7 = tpu.matmul %5, %6, %cst_7 {dimension_numbers = #tpu.dot_dimension_numbers<[1], [0], [0], [1], [0, 0, 1, 1], [], []>} : vector<16x16xbf16>, vector<16x512xbf16>, vector<16x512xf32> -> vector<16x512xf32>
    %cst_8 = arith.constant 0.000000e+00 : f32
    %8 = vector.broadcast %cst_8 : f32 to vector<16x512xf32>
    %9 = arith.maximumf %7, %8 : vector<16x512xf32>
    %10 = arith.truncf %9 : vector<16x512xf32> to vector<16x512xbf16>
    %c0_9 = arith.constant 0 : index
    %c0_10 = arith.constant 0 : index
    %11 = vector.load %arg5[%c0_9, %c0_10] : memref<16x512xbf16, #tpu.memory_space<vmem>>, vector<16x512xbf16>
    tpu.vector_store %arg5[%c0_9, %c0_10], %10 {strides = array<i32>} : memref<16x512xbf16, #tpu.memory_space<vmem>>, vector<16x512xbf16>,
    return
  }
  func.func @transform_0(%arg0: i32) -> (i32, i32) {
    %c0_i32 = arith.constant 0 : i32
    %c0_i32_0 = arith.constant 0 : i32
    return %c0_i32, %arg0 : i32, i32
  }
  func.func @transform_1(%arg0: i32) -> (i32, i32) {
    %c0_i32 = arith.constant 0 : i32
    %c0_i32_0 = arith.constant 0 : i32
    %c0_i32_1 = arith.constant 0 : i32
    return %c0_i32, %c0_i32_0 : i32, i32
  }
  func.func @transform_2(%arg0: i32) -> (i32, i32) {
    %c0_i32 = arith.constant 0 : i32
    %c0_i32_0 = arith.constant 0 : i32
    %c0_i32_1 = arith.constant 0 : i32
    return %c0_i32, %c0_i32_0 : i32, i32
  }
  func.func @transform_3(%arg0: i32) -> (i32, i32) {
    %c0_i32 = arith.constant 0 : i32
    %c0_i32_0 = arith.constant 0 : i32
    return %c0_i32, %arg0 : i32, i32
  }
  func.func @transform_4(%arg0: i32) -> (i32, i32) {
    %c0_i32 = arith.constant 0 : i32
    %c0_i32_0 = arith.constant 0 : i32
    return %c0_i32, %arg0 : i32, i32
  }
}

module attributes {stable_mosaic.version = 11 : i64} {
  func.func @_conv_act_kernel(%arg0: i32, %arg1: memref<512x128xbf16, #tpu.memory_space<vmem>>, %arg2: memref<24x512xbf16, #tpu.memory_space<vmem>>, %arg3: memref<24x24xbf16, #tpu.memory_space<vmem>>, %arg4: memref<24x128xbf16, #tpu.memory_space<vmem>>, %arg5: memref<24x128xbf16, #tpu.memory_space<vmem>>) attributes {dimension_semantics = [#tpu.dimension_semantics<parallel>], iteration_bounds = array<i64: 1>, scalar_prefetch = 0 : i64, scratch_operands = 0 : i64, tpu.core_type = #tpu.core_type<tc>, window_params = [{transform_indices = @transform_0, window_bounds = array<i64: 512, 128>}, {pipeline_mode = #tpu.pipeline_mode<synchronous>, transform_indices = @transform_1, window_bounds = array<i64: 24, 512>}, {pipeline_mode = #tpu.pipeline_mode<synchronous>, transform_indices = @transform_2, window_bounds = array<i64: 24, 24>}, {transform_indices = @transform_3, window_bounds = array<i64: 24, 128>}, {transform_indices = @transform_4, window_bounds = array<i64: 24, 128>}]} {
    %c0 = arith.constant 0 : index
    %c0_0 = arith.constant 0 : index
    %0 = vector.load %arg2[%c0, %c0_0] : memref<24x512xbf16, #tpu.memory_space<vmem>>, vector<24x512xbf16>
    %c0_1 = arith.constant 0 : index
    %c0_2 = arith.constant 0 : index
    %1 = vector.load %arg1[%c0_1, %c0_2] : memref<512x128xbf16, #tpu.memory_space<vmem>>, vector<512x128xbf16>
    %cst = arith.constant dense<0.000000e+00> : vector<24x128xf32>
    %2 = tpu.matmul %0, %1, %cst {dimension_numbers = #tpu.dot_dimension_numbers<[1], [0], [0], [1], [0, 0, 1, 1], [], []>} : vector<24x512xbf16>, vector<512x128xbf16>, vector<24x128xf32> -> vector<24x128xf32>
    %3 = arith.truncf %2 : vector<24x128xf32> to vector<24x128xbf16>
    %c0_3 = arith.constant 0 : index
    %c0_4 = arith.constant 0 : index
    %4 = vector.load %arg4[%c0_3, %c0_4] : memref<24x128xbf16, #tpu.memory_space<vmem>>, vector<24x128xbf16>
    tpu.vector_store %arg4[%c0_3, %c0_4], %3 {strides = array<i32>} : memref<24x128xbf16, #tpu.memory_space<vmem>>, vector<24x128xbf16>,
    %c0_5 = arith.constant 0 : index
    %c0_6 = arith.constant 0 : index
    %5 = vector.load %arg3[%c0_5, %c0_6] : memref<24x24xbf16, #tpu.memory_space<vmem>>, vector<24x24xbf16>
    %6 = arith.truncf %2 : vector<24x128xf32> to vector<24x128xbf16>
    %cst_7 = arith.constant dense<0.000000e+00> : vector<24x128xf32>
    %7 = tpu.matmul %5, %6, %cst_7 {dimension_numbers = #tpu.dot_dimension_numbers<[1], [0], [0], [1], [0, 0, 1, 1], [], []>} : vector<24x24xbf16>, vector<24x128xbf16>, vector<24x128xf32> -> vector<24x128xf32>
    %cst_8 = arith.constant 0.000000e+00 : f32
    %8 = vector.broadcast %cst_8 : f32 to vector<24x128xf32>
    %9 = arith.maximumf %7, %8 : vector<24x128xf32>
    %10 = arith.truncf %9 : vector<24x128xf32> to vector<24x128xbf16>
    %c0_9 = arith.constant 0 : index
    %c0_10 = arith.constant 0 : index
    %11 = vector.load %arg5[%c0_9, %c0_10] : memref<24x128xbf16, #tpu.memory_space<vmem>>, vector<24x128xbf16>
    tpu.vector_store %arg5[%c0_9, %c0_10], %10 {strides = array<i32>} : memref<24x128xbf16, #tpu.memory_space<vmem>>, vector<24x128xbf16>,
    return
  }
  func.func @transform_0(%arg0: i32) -> (i32, i32) {
    %c0_i32 = arith.constant 0 : i32
    %c0_i32_0 = arith.constant 0 : i32
    return %c0_i32, %arg0 : i32, i32
  }
  func.func @transform_1(%arg0: i32) -> (i32, i32) {
    %c0_i32 = arith.constant 0 : i32
    %c0_i32_0 = arith.constant 0 : i32
    %c0_i32_1 = arith.constant 0 : i32
    return %c0_i32, %c0_i32_0 : i32, i32
  }
  func.func @transform_2(%arg0: i32) -> (i32, i32) {
    %c0_i32 = arith.constant 0 : i32
    %c0_i32_0 = arith.constant 0 : i32
    %c0_i32_1 = arith.constant 0 : i32
    return %c0_i32, %c0_i32_0 : i32, i32
  }
  func.func @transform_3(%arg0: i32) -> (i32, i32) {
    %c0_i32 = arith.constant 0 : i32
    %c0_i32_0 = arith.constant 0 : i32
    return %c0_i32, %arg0 : i32, i32
  }
  func.func @transform_4(%arg0: i32) -> (i32, i32) {
    %c0_i32 = arith.constant 0 : i32
    %c0_i32_0 = arith.constant 0 : i32
    return %c0_i32, %arg0 : i32, i32
  }
}

module attributes {stable_mosaic.version = 11 : i64} {
  func.func @_conv_act_kernel(%arg0: i32, %arg1: memref<768x128xbf16, #tpu.memory_space<vmem>>, %arg2: memref<32x768xbf16, #tpu.memory_space<vmem>>, %arg3: memref<32x32xbf16, #tpu.memory_space<vmem>>, %arg4: memref<32x128xbf16, #tpu.memory_space<vmem>>, %arg5: memref<32x128xbf16, #tpu.memory_space<vmem>>) attributes {dimension_semantics = [#tpu.dimension_semantics<parallel>], iteration_bounds = array<i64: 1>, scalar_prefetch = 0 : i64, scratch_operands = 0 : i64, tpu.core_type = #tpu.core_type<tc>, window_params = [{transform_indices = @transform_0, window_bounds = array<i64: 768, 128>}, {pipeline_mode = #tpu.pipeline_mode<synchronous>, transform_indices = @transform_1, window_bounds = array<i64: 32, 768>}, {pipeline_mode = #tpu.pipeline_mode<synchronous>, transform_indices = @transform_2, window_bounds = array<i64: 32, 32>}, {transform_indices = @transform_3, window_bounds = array<i64: 32, 128>}, {transform_indices = @transform_4, window_bounds = array<i64: 32, 128>}]} {
    %c0 = arith.constant 0 : index
    %c0_0 = arith.constant 0 : index
    %0 = vector.load %arg2[%c0, %c0_0] : memref<32x768xbf16, #tpu.memory_space<vmem>>, vector<32x768xbf16>
    %c0_1 = arith.constant 0 : index
    %c0_2 = arith.constant 0 : index
    %1 = vector.load %arg1[%c0_1, %c0_2] : memref<768x128xbf16, #tpu.memory_space<vmem>>, vector<768x128xbf16>
    %cst = arith.constant dense<0.000000e+00> : vector<32x128xf32>
    %2 = tpu.matmul %0, %1, %cst {dimension_numbers = #tpu.dot_dimension_numbers<[1], [0], [0], [1], [0, 0, 1, 1], [], []>} : vector<32x768xbf16>, vector<768x128xbf16>, vector<32x128xf32> -> vector<32x128xf32>
    %3 = arith.truncf %2 : vector<32x128xf32> to vector<32x128xbf16>
    %c0_3 = arith.constant 0 : index
    %c0_4 = arith.constant 0 : index
    %4 = vector.load %arg4[%c0_3, %c0_4] : memref<32x128xbf16, #tpu.memory_space<vmem>>, vector<32x128xbf16>
    tpu.vector_store %arg4[%c0_3, %c0_4], %3 {strides = array<i32>} : memref<32x128xbf16, #tpu.memory_space<vmem>>, vector<32x128xbf16>,
    %c0_5 = arith.constant 0 : index
    %c0_6 = arith.constant 0 : index
    %5 = vector.load %arg3[%c0_5, %c0_6] : memref<32x32xbf16, #tpu.memory_space<vmem>>, vector<32x32xbf16>
    %6 = arith.truncf %2 : vector<32x128xf32> to vector<32x128xbf16>
    %cst_7 = arith.constant dense<0.000000e+00> : vector<32x128xf32>
    %7 = tpu.matmul %5, %6, %cst_7 {dimension_numbers = #tpu.dot_dimension_numbers<[1], [0], [0], [1], [0, 0, 1, 1], [], []>} : vector<32x32xbf16>, vector<32x128xbf16>, vector<32x128xf32> -> vector<32x128xf32>
    %cst_8 = arith.constant 0.000000e+00 : f32
    %8 = vector.broadcast %cst_8 : f32 to vector<32x128xf32>
    %9 = arith.maximumf %7, %8 : vector<32x128xf32>
    %10 = arith.truncf %9 : vector<32x128xf32> to vector<32x128xbf16>
    %c0_9 = arith.constant 0 : index
    %c0_10 = arith.constant 0 : index
    %11 = vector.load %arg5[%c0_9, %c0_10] : memref<32x128xbf16, #tpu.memory_space<vmem>>, vector<32x128xbf16>
    tpu.vector_store %arg5[%c0_9, %c0_10], %10 {strides = array<i32>} : memref<32x128xbf16, #tpu.memory_space<vmem>>, vector<32x128xbf16>,
    return
  }
  func.func @transform_0(%arg0: i32) -> (i32, i32) {
    %c0_i32 = arith.constant 0 : i32
    %c0_i32_0 = arith.constant 0 : i32
    return %c0_i32, %arg0 : i32, i32
  }
  func.func @transform_1(%arg0: i32) -> (i32, i32) {
    %c0_i32 = arith.constant 0 : i32
    %c0_i32_0 = arith.constant 0 : i32
    %c0_i32_1 = arith.constant 0 : i32
    return %c0_i32, %c0_i32_0 : i32, i32
  }
  func.func @transform_2(%arg0: i32) -> (i32, i32) {
    %c0_i32 = arith.constant 0 : i32
    %c0_i32_0 = arith.constant 0 : i32
    %c0_i32_1 = arith.constant 0 : i32
    return %c0_i32, %c0_i32_0 : i32, i32
  }
  func.func @transform_3(%arg0: i32) -> (i32, i32) {
    %c0_i32 = arith.constant 0 : i32
    %c0_i32_0 = arith.constant 0 : i32
    return %c0_i32, %arg0 : i32, i32
  }
  func.func @transform_4(%arg0: i32) -> (i32, i32) {
    %c0_i32 = arith.constant 0 : i32
    %c0_i32_0 = arith.constant 0 : i32
    return %c0_i32, %arg0 : i32, i32
  }
}

module attributes {stable_mosaic.version = 11 : i64} {
  func.func @_head_kernel(%arg0: i32, %arg1: memref<1024x2xbf16, #tpu.memory_space<vmem>>, %arg2: memref<40x1024xbf16, #tpu.memory_space<vmem>>, %arg3: memref<40x40xbf16, #tpu.memory_space<vmem>>, %arg4: memref<40x1xf32, #tpu.memory_space<vmem>>, %arg5: memref<40x2xf32, #tpu.memory_space<vmem>>) attributes {dimension_semantics = [#tpu.dimension_semantics<arbitrary>], iteration_bounds = array<i64: 1>, scalar_prefetch = 0 : i64, scratch_operands = 0 : i64, tpu.core_type = #tpu.core_type<tc>, window_params = [{pipeline_mode = #tpu.pipeline_mode<synchronous>, transform_indices = @transform_0, window_bounds = array<i64: 1024, 2>}, {pipeline_mode = #tpu.pipeline_mode<synchronous>, transform_indices = @transform_1, window_bounds = array<i64: 40, 1024>}, {pipeline_mode = #tpu.pipeline_mode<synchronous>, transform_indices = @transform_2, window_bounds = array<i64: 40, 40>}, {pipeline_mode = #tpu.pipeline_mode<synchronous>, transform_indices = @transform_3, window_bounds = array<i64: 40, 1>}, {pipeline_mode = #tpu.pipeline_mode<synchronous>, transform_indices = @transform_4, window_bounds = array<i64: 40, 2>}]} {
    %c0 = arith.constant 0 : index
    %c0_0 = arith.constant 0 : index
    %0 = vector.load %arg2[%c0, %c0_0] : memref<40x1024xbf16, #tpu.memory_space<vmem>>, vector<40x1024xbf16>
    %c0_1 = arith.constant 0 : index
    %c0_2 = arith.constant 0 : index
    %1 = vector.load %arg1[%c0_1, %c0_2] : memref<1024x2xbf16, #tpu.memory_space<vmem>>, vector<1024x2xbf16>
    %cst = arith.constant dense<0.000000e+00> : vector<40x2xf32>
    %2 = tpu.matmul %0, %1, %cst {dimension_numbers = #tpu.dot_dimension_numbers<[1], [0], [0], [1], [0, 0, 1, 1], [], []>} : vector<40x1024xbf16>, vector<1024x2xbf16>, vector<40x2xf32> -> vector<40x2xf32>
    %c0_3 = arith.constant 0 : index
    %c0_4 = arith.constant 0 : index
    %3 = vector.load %arg3[%c0_3, %c0_4] : memref<40x40xbf16, #tpu.memory_space<vmem>>, vector<40x40xbf16>
    %4 = arith.truncf %2 : vector<40x2xf32> to vector<40x2xbf16>
    %cst_5 = arith.constant dense<0.000000e+00> : vector<40x2xf32>
    %5 = tpu.matmul %3, %4, %cst_5 {dimension_numbers = #tpu.dot_dimension_numbers<[1], [0], [0], [1], [0, 0, 1, 1], [], []>} : vector<40x40xbf16>, vector<40x2xbf16>, vector<40x2xf32> -> vector<40x2xf32>
    %c0_6 = arith.constant 0 : index
    %c0_7 = arith.constant 0 : index
    %6 = vector.load %arg4[%c0_6, %c0_7] : memref<40x1xf32, #tpu.memory_space<vmem>>, vector<40x1xf32>
    %7 = vector.broadcast %6 : vector<40x1xf32> to vector<40x2xf32>
    %8 = arith.addf %5, %7 : vector<40x2xf32>
    %cst_8 = arith.constant 0.000000e+00 : f32
    %9 = vector.broadcast %cst_8 : f32 to vector<40x2xf32>
    %10 = arith.subf %9, %8 : vector<40x2xf32>
    %11 = math.exp %10 : vector<40x2xf32>
    %cst_9 = arith.constant 1.000000e+00 : f32
    %12 = vector.broadcast %cst_9 : f32 to vector<40x2xf32>
    %13 = arith.addf %12, %11 : vector<40x2xf32>
    %cst_10 = arith.constant 1.000000e+00 : f32
    %14 = vector.broadcast %cst_10 : f32 to vector<40x2xf32>
    %15 = arith.divf %14, %13 : vector<40x2xf32>
    %c0_11 = arith.constant 0 : index
    %c0_12 = arith.constant 0 : index
    %16 = vector.load %arg5[%c0_11, %c0_12] : memref<40x2xf32, #tpu.memory_space<vmem>>, vector<40x2xf32>
    tpu.vector_store %arg5[%c0_11, %c0_12], %15 {strides = array<i32>} : memref<40x2xf32, #tpu.memory_space<vmem>>, vector<40x2xf32>,
    return
  }
  func.func @transform_0(%arg0: i32) -> (i32, i32) {
    %c0_i32 = arith.constant 0 : i32
    %c0_i32_0 = arith.constant 0 : i32
    %c0_i32_1 = arith.constant 0 : i32
    return %c0_i32, %c0_i32_0 : i32, i32
  }
  func.func @transform_1(%arg0: i32) -> (i32, i32) {
    %c0_i32 = arith.constant 0 : i32
    %c0_i32_0 = arith.constant 0 : i32
    %c0_i32_1 = arith.constant 0 : i32
    return %c0_i32, %c0_i32_0 : i32, i32
  }
  func.func @transform_2(%arg0: i32) -> (i32, i32) {
    %c0_i32 = arith.constant 0 : i32
    %c0_i32_0 = arith.constant 0 : i32
    %c0_i32_1 = arith.constant 0 : i32
    return %c0_i32, %c0_i32_0 : i32, i32
  }
  func.func @transform_3(%arg0: i32) -> (i32, i32) {
    %c0_i32 = arith.constant 0 : i32
    %c0_i32_0 = arith.constant 0 : i32
    %c0_i32_1 = arith.constant 0 : i32
    return %c0_i32, %c0_i32_0 : i32, i32
  }
  func.func @transform_4(%arg0: i32) -> (i32, i32) {
    %c0_i32 = arith.constant 0 : i32
    %c0_i32_0 = arith.constant 0 : i32
    %c0_i32_1 = arith.constant 0 : i32
    return %c0_i32, %c0_i32_0 : i32, i32
  }
}

</mosaic_0001>

<bundles_post_ra>
// kernel: clf_img_forward.5
= control target key start
LH: loop header
LB: loop body
LE: loop exit
PB: predicated region body
PF: predicated region fallthrough
CT: control target
= control target key end

     0   :  { %s1231_s15 = smov 0   ;;  %s1233_s16 = smov 0   ;;  %s1411_s0 = inlined_call_operand.vmem [shape: bf16[32,2304], index: 0, kind: input, shape index: {}]   ;;  %s1412_s1 = inlined_call_operand.vmem [shape: bf16[8,32], index: 1, kind: input, shape index: {}]   ;;  %s1413_s2 = inlined_call_operand.vmem [shape: bf16[8,8], index: 2, kind: input, shape index: {}]   ;;  %s1414_s3 = inlined_call_operand.vmem [shape: bf16[8,2304], index: 3, kind: output, shape index: {0}]   ;;  %s1415_s4 = inlined_call_operand.vmem [shape: bf16[8,2304], index: 4, kind: output, shape index: {1}]  }
   0x1   :  { %s1235_s17 = smov 0  }
   0x2 LB: > { %s1034_s18 = sadd.s32 4294967295, %s1201_s17   ;;  %s1248_s19 = sadd.s32 1, %s1201_s17   ;;  %s1201_s17 = sphi %s1235_s17, %s1418_s17   ;;  %s1197_s16 = sphi %s1233_s16, %s1417_s16   ;;  %s1193_s15 = sphi %s1231_s15, %s1416_s15  }
   0x3   : > { %s19_s20 = ssub.s32 %s1201_s17, %s1248_s19  ;;  %s22_s21 = sadd.s32 1, %s1197_s16 }
   0x4   : > { %p20_p0 = scmp.eq.s32.totalorder %s19_s20, 0  ;;  %p29_p1 = scmp.ne.s32.totalorder %s1197_s16, %s1193_s15 }
   0x5   : > { %p30_p2 = scmp.eq.s32.totalorder %s1201_s17, 0  ;;  %p1037_p4 = scmp.ge.s32.totalorder %s1201_s17, 2 }
   0x6   : > { %s1257_s22 = scalar_select %p20_p0, %s1197_s16, %s22_s21  }
   0x7   : > { %p31_p3 = por %p30_p2, %p29_p1  ;;  %155 = sbr.rel (%p1037_p4) target bundleno = 27 (0x1b), region = 24 }
   0xc   : > { %158 = sbr.rel (!%p31_p3) target bundleno = 27 (0x1b), region = 28  ;;  %s160_s23 = sand.u32 (%p31_p3), 1, %s1197_s16  }
   0xd   : > { %s1094_s24 = smul.u32 (%p31_p3), 36, %s1201_s17 }
   0xe   : > { %s1124_s25 = smul.u32 (%p31_p3), 144, %s160_s23 }
   0xf   : > { %s1265_s28 = scalar_lea.vmem (%p31_p3), %s1411_s0, %s1094_s24 }
  0x10   : > { %v180_v0 = vld [vmem:[%s1265_s28] sm:$0xff] (%p31_p3)  ;;  %v182_v1 = vld [vmem:[%s1265_s28 + $0x8] sm:$0xff] (%p31_p3)  ;;  %v184_v2 = vld [vmem:[%s1265_s28 + $0x10] sm:$0xff] (%p31_p3)  ;;  %s1270_s29 = scalar_lea.vmem (%p31_p3), [#allocation2], %s1124_s25 }
  0x11   : > { %181 = vst [vmem:[%s1270_s29] sm:$0xff] %v180_v0  ;;  %183 = vst [vmem:[%s1270_s29 + $0x8] sm:$0xff] %v182_v1  ;;  %v186_v3 = vld [vmem:[%s1265_s28 + $0x18] sm:$0xff]  ;;  %v188_v4 = vld [vmem:[%s1265_s28 + $0x48] sm:$0xff] }
  0x12   : > { %185 = vst [vmem:[%s1270_s29 + $0x10] sm:$0xff] %v184_v2  ;;  %v190_v5 = vld [vmem:[%s1265_s28 + $0x50] sm:$0xff]  ;;  %187 = vst [vmem:[%s1270_s29 + $0x18] sm:$0xff] %v186_v3  ;;  %v192_v6 = vld [vmem:[%s1265_s28 + $0x58] sm:$0xff] }
  0x13   : > { %189 = vst [vmem:[%s1270_s29 + $0x24] sm:$0xff] %v188_v4  ;;  %191 = vst [vmem:[%s1270_s29 + $0x2c] sm:$0xff] %v190_v5  ;;  %v194_v7 = vld [vmem:[%s1265_s28 + $0x60] sm:$0xff]  ;;  %v196_v8 = vld [vmem:[%s1265_s28 + $0x90] sm:$0xff] }
  0x14   : > { %193 = vst [vmem:[%s1270_s29 + $0x34] sm:$0xff] %v192_v6  ;;  %195 = vst [vmem:[%s1270_s29 + $0x3c] sm:$0xff] %v194_v7  ;;  %v198_v9 = vld [vmem:[%s1265_s28 + $0x98] sm:$0xff]  ;;  %v200_v10 = vld [vmem:[%s1265_s28 + $0xa0] sm:$0xff] }
  0x15   : > { %197 = vst [vmem:[%s1270_s29 + $0x48] sm:$0xff] %v196_v8  ;;  %v202_v11 = vld [vmem:[%s1265_s28 + $0xa8] sm:$0xff]  ;;  %199 = vst [vmem:[%s1270_s29 + $0x50] sm:$0xff] %v198_v9  ;;  %v204_v12 = vld [vmem:[%s1265_s28 + $0xd8] sm:$0xff] }
  0x16   : > { %201 = vst [vmem:[%s1270_s29 + $0x58] sm:$0xff] %v200_v10  ;;  %203 = vst [vmem:[%s1270_s29 + $0x60] sm:$0xff] %v202_v11  ;;  %v206_v13 = vld [vmem:[%s1265_s28 + $0xe0] sm:$0xff]  ;;  %v208_v14 = vld [vmem:[%s1265_s28 + $0xe8] sm:$0xff] }
  0x17   : > { %205 = vst [vmem:[%s1270_s29 + $0x6c] sm:$0xff] %v204_v12  ;;  %207 = vst [vmem:[%s1270_s29 + $0x74] sm:$0xff] %v206_v13  ;;  %v210_v15 = vld [vmem:[%s1265_s28 + $0xf0] sm:$0xff]  ;;  %v1039_v16 = vld [vmem:[%s1265_s28 + $0x20] sm:$0xf] }
  0x18   : > { %209 = vst [vmem:[%s1270_s29 + $0x7c] sm:$0xff] %v208_v14  ;;  %v1041_v17 = vld [vmem:[%s1265_s28 + $0x68] sm:$0xf]  ;;  %211 = vst [vmem:[%s1270_s29 + $0x84] sm:$0xff] %v210_v15  ;;  %v1043_v18 = vld [vmem:[%s1265_s28 + $0xb0] sm:$0xf] }
  0x19   : > { %1040 = vst [vmem:[%s1270_s29 + $0x20] sm:$0xf] %v1039_v16  ;;  %1042 = vst [vmem:[%s1270_s29 + $0x44] sm:$0xf] %v1041_v17  ;;  %v1045_v19 = vld [vmem:[%s1265_s28 + $0xf8] sm:$0xf] }
  0x1a   : > { %1044 = vst [vmem:[%s1270_s29 + $0x68] sm:$0xf] %v1043_v18  ;;  %1046 = vst [vmem:[%s1270_s29 + $0x8c] sm:$0xf] %v1045_v19 }
  0x1b PF: > { %p1047_p5 = scmp.ge.s32.totalorder %s1201_s17, 1  ;;  %p232_p6 = scmp.lt.s32.totalorder %s1201_s17, 3 }
  0x1d   : > { %p233_p7 = pnand %p1047_p5, %p232_p6 }
  0x1e   : > { %s239_s30 = sand.u32 (!%p233_p7), 1, %s1193_s15   ;;  %s270_s9 = smul.u32 (!%p233_p7), 9, %s1034_s18 }
  0x1f   : > { %236 = sbr.rel (%p233_p7) target bundleno = 462 (0x1ce), region = 54 }
  0x20   : > { %s1125_s5 = smul.u32 (!%p233_p7), 144, %s239_s30  ;;  %p271_p8 = scmp.lt.s32.totalorder (!%p233_p7), %s270_s9, 17 }
  0x22   : > { %s1314_s6 = scalar_lea.vmem (!%p233_p7), [#allocation2], %s1125_s5 }
  0x24   : > { %v1203_v20 = vmov 0   ;;  %v1153_v21 = vld [vmem:[%s1314_s6 + $0x4c] ss:$36 sps:$4 sm:$0xff]   ;;  %v1156_v23 = vld [vmem:[%s1314_s6 + $0x54] ss:$36 sps:$4 sm:$0xff]   ;;  %vm396_vm0 = vcmask 261120  }
  0x25   : > { %432 = vmatprep.mubr.bf16.mxu0 %v1203_v20  ;;  %473 = vmatprep.mubr.bf16.mxu1 %v1203_v20  ;;  %v1155_v22 = vld [vmem:[%s1314_s6 + $0x48] ss:$36 sps:$4 sm:$0xff]   ;;  %v1158_v24 = vld [vmem:[%s1314_s6 + $0x50] ss:$36 sps:$4 sm:$0xff]   ;;  %v1161_v26 = vld [vmem:[%s1314_s6] ss:$36 sps:$4 sm:$0xff]  }
  0x26   : > { %412 = vmatprep.subr.bf16.mxu0 %v1153_v21  ;;  %v1159_v25 = vld [vmem:[%s1314_s6 + $0x4] ss:$36 sps:$4 sm:$0xff]   ;;  %453 = vmatprep.subr.bf16.mxu1 %v1156_v23  ;;  %v1162_v27 = vld [vmem:[%s1314_s6 + $0xc] ss:$36 sps:$4 sm:$0xff]   ;;  %v1167_v30 = vld [vmem:[%s1314_s6 + $0x5c] ss:$36 sps:$4 sm:$0xff]  }
  0x27   : > { %413 = vmatpush1.bf16.msra.mxu0 %v1155_v22  ;;  %454 = vmatpush1.bf16.msra.mxu1 %v1158_v24  ;;  %v1164_v28 = vld [vmem:[%s1314_s6 + $0x8] ss:$36 sps:$4 sm:$0xff]   ;;  %v283_v29 = vld [vmem:[%s1412_s1] sm:$0xf]  ;;  %v1165_v31 = vld [vmem:[%s1314_s6 + $0x58] ss:$36 sps:$4 sm:$0xff]  }
  0x28   : > { %414 = vmatprep.subr.bf16.mxu0 %v1159_v25  ;;  %455 = vmatprep.subr.bf16.mxu1 %v1162_v27  ;;  %v1170_v32 = vld [vmem:[%s1314_s6 + $0x64] ss:$36 sps:$4 sm:$0xff]   ;;  %v1173_v34 = vld [vmem:[%s1314_s6 + $0x14] ss:$36 sps:$4 sm:$0xff]   ;;  %v1176_v35 = vld [vmem:[%s1314_s6 + $0x1c] ss:$36 sps:$4 sm:$0xff]  }
  0x29   : > { %v1168_v33 = vld [vmem:[%s1314_s6 + $0x60] ss:$36 sps:$4 sm:$0xff]   ;;  %v1171_v36 = vld [vmem:[%s1314_s6 + $0x10] ss:$36 sps:$4 sm:$0xff]   ;;  %v1174_v37 = vld [vmem:[%s1314_s6 + $0x18] ss:$36 sps:$4 sm:$0xff]  }
  0x2a   : > { %v1177_v38 = vld [vmem:[%s1314_s6 + $0x68] ss:$36 sps:$4 sm:$0xff]   ;;  %v1204_v39 = vmov 0.0   ;;  %v1178_v40 = vld [vmem:[%s1314_s6 + $0x20] ss:$36 sps:$4 sm:$0xff]   ;;  %vm1205_vm1 = vmmov 0  }
  0x2b   : > { %415 = vmatpush1.bf16.msra.mxu0 %v1161_v26  ;;  %456 = vmatpush1.bf16.msra.mxu1 %v1164_v28  ;;  %s1420_s9 = smov (!%p271_p8, %s270_s9), 17  ;;  %vm651_vm2 = vcmask 1043456   ;;  %v646_v56 = vld [vmem:[%s1413_s2] sm:$0xf]  ;;  %vm647_vm3 = vcmask 64512  }
  0x2c   : > { %494 = vmatprep.subr.bf16.mxu0 %v1167_v30  ;;  %535 = vmatprep.subr.bf16.mxu1 %v1170_v32  ;;  %s1048_s10 = sshll.u32 %s1420_s9, 2 }
  0x2d   : > { %s1360_s13 = scalar_lea.vmem %s1414_s3, %s1048_s10  ;;  %s1394_s20 = scalar_lea.vmem %s1415_s4, %s1048_s10 }
  0x2e   : > { %1068 = vmatmul.mubr.msk.bf16.vlgmr.msra.gmra.mxu0 %vm396_vm0, %v283_v29  ;;  %1069 = vmatmul.mubr.msk.bf16.vlgmr.msra.gmra.mxu1 %vm396_vm0, %v283_v29 }
  0x2f   : > { %495 = vmatpush1.bf16.msra.mxu0 %v1165_v31  ;;  %514 = vmatprep.mubr.bf16.mxu0 %v1203_v20 }
  0x30   : > { %496 = vmatprep.subr.bf16.mxu0 %v1173_v34  ;;  %536 = vmatpush1.bf16.msra.mxu1 %v1168_v33 }
  0x31   : > { %555 = vmatprep.mubr.bf16.mxu1 %v1203_v20  ;;  %537 = vmatprep.subr.bf16.mxu1 %v1176_v35 }
  0x33   : > { %497 = vmatpush1.bf16.msra.mxu0 %v1171_v36 }
  0x34   : > { %1110 = vmatprep.subr.bf16.mxu0 %v1204_v39  ;;  %538 = vmatpush1.bf16.msra.mxu1 %v1174_v37 }
  0x36   : > { %1070 = vmatmul.mubr.msk.bf16.vlgmr.msra.gmra.mxu0 %vm396_vm0, %v283_v29 }
  0x37   : > { %1111 = vmatpush3.bf16.msra.mxu0 %v1177_v38  ;;  %1114 = vmatprep.mubr.msk.bf16.mxu0 %vm1205_vm1, %v1204_v39 }
  0x38   : > { %1071 = vmatmul.mubr.msk.bf16.vlgmr.msra.gmra.mxu1 %vm396_vm0, %v283_v29  ;;  %1112 = vmatprep.subr.bf16.mxu0 %v1204_v39 }
  0x39   : > { %711 = vmatprep.mubr.bf16.mxu1 %v1203_v20 }
  0x3b   : > { %1113 = vmatpush3.bf16.msra.mxu0 %v1178_v40 }
  0x3e   : > { %1115 = vmatmul.mubr.msk.bf16.vlgmr.msra.gmra.mxu0 %vm396_vm0, %v283_v29 }
  0x3f   : > { %752 = vmatprep.mubr.bf16.mxu0 %v1203_v20 }
  0xee   : > { %v434_v41 = vpop.f32.mrf.mxu0  ;;  %v475_v43 = vpop.f32.mrf.mxu1 }
  0xef   : > { %v604_v42 = vpack.c.bf16 %v434_v41, %v434_v41  ;;  %v606_v45 = vpack.c.bf16 %v475_v43, %v475_v43 }
  0xf0   : > { %v436_v44 = vpop.f32.mrf.mxu0  ;;  %v477_v48 = vpop.f32.mrf.mxu1 }
  0xf1   : > { %v605_v46 = vpack.c.bf16 %v436_v44, %v436_v44  ;;  %v1095_v47 = vpack.c.bf16 %v436_v44, %v434_v41  ;;  %v607_v50 = vpack.c.bf16 %v477_v48, %v477_v48  ;;  %v1096_v51 = vpack.c.bf16 %v477_v48, %v475_v43 }
  0xf2   : > { %v438_v49 = vpop.f32.mrf.mxu0  ;;  %v653_v52 = vsel %vm651_vm2, %v604_v42, 0  ;;  %v659_v53 = vsel %vm651_vm2, %v606_v45, 0  ;;  %v479_v54 = vpop.f32.mrf.mxu1 }
  0xf3   : > { %641 = vst [vmem:[%s1360_s13] sm:$0xff] %v1095_v47  ;;  %1078 = vmatprep.subr.msk.bf16.mxu1 %vm651_vm2, %v605_v46  ;;  %642 = vst [vmem:[%s1360_s13 + $0x8] sm:$0xff] %v1096_v51  ;;  %1080 = vmatprep.subr.msk.bf16.mxu0 %vm651_vm2, %v607_v50 }
  0xf4   : > { %v439_v55 = vpop.f32.mrf.mxu0  ;;  %694 = vmatpush1.bf16.msra.mxu1 %v653_v52  ;;  %v480_v57 = vpop.f32.mrf.mxu1  ;;  %735 = vmatpush1.bf16.msra.mxu0 %v659_v53 }
  0xf6   : > { %v516_v58 = vpop.f32.mrf.mxu0 }
  0xf7   : > { %v608_v59 = vpack.c.bf16 %v516_v58, %v516_v58  ;;  %1079 = vmatmul.mubr.msk.bf16.vlgmr.msra.gmra.mxu1 %vm647_vm3, %v646_v56  ;;  %1081 = vmatmul.mubr.msk.bf16.vlgmr.msra.gmra.mxu0 %vm647_vm3, %v646_v56 }
  0xf8   : > { %v557_v60 = vpop.f32.mrf.mxu1  ;;  %v518_v61 = vpop.f32.mrf.mxu0  ;;  %793 = vmatprep.mubr.bf16.mxu1 %v1203_v20  ;;  %834 = vmatprep.mubr.bf16.mxu0 %v1203_v20 }
  0xf9   : > { %v610_v62 = vpack.c.bf16 %v557_v60, %v557_v60  ;;  %v609_v63 = vpack.c.bf16 %v518_v61, %v518_v61  ;;  %v1097_v0 = vpack.c.bf16 %v518_v61, %v516_v58  ;;  %v665_v5 = vsel %vm651_vm2, %v608_v59, 0 }
  0xfa   : > { %v559_v1 = vpop.f32.mrf.mxu1  ;;  %v520_v2 = vpop.f32.mrf.mxu0 }
  0xfb   : > { %643 = vst [vmem:[%s1360_s13 + $0x10] sm:$0xff] %v1097_v0  ;;  %v611_v3 = vpack.c.bf16 %v559_v1, %v559_v1  ;;  %v1098_v4 = vpack.c.bf16 %v559_v1, %v557_v60  ;;  %1082 = vmatprep.subr.msk.bf16.mxu1 %vm651_vm2, %v609_v63  ;;  %v671_v6 = vsel %vm651_vm2, %v610_v62, 0 }
  0xfc   : > { %v561_v7 = vpop.f32.mrf.mxu1  ;;  %v521_v8 = vpop.f32.mrf.mxu0  ;;  %776 = vmatpush1.bf16.msra.mxu1 %v665_v5 }
  0xfd   : > { %644 = vst [vmem:[%s1360_s13 + $0x18] sm:$0xff] %v1098_v4  ;;  %1084 = vmatprep.subr.msk.bf16.mxu0 %vm651_vm2, %v611_v3  ;;  %1118 = vmatprep.subr.bf16.mxu1 %v1204_v39 }
  0xfe   : > { %v562_v9 = vpop.f32.mrf.mxu1  ;;  %v598_v10 = vpop.f32.mrf.mxu0  ;;  %817 = vmatpush1.bf16.msra.mxu0 %v671_v6 }
  0xff   : > { %v612_v11 = vpack.c.bf16 %v598_v10, %v598_v10  ;;  %1083 = vmatmul.mubr.msk.bf16.vlgmr.msra.gmra.mxu1 %vm647_vm3, %v646_v56 }
 0x100   : > { %v1116_v12 = vpop.f32.mrf.mxu0  ;;  %1120 = vmatprep.mubr.msk.bf16.mxu1 %vm1205_vm1, %v1204_v39 }
 0x101   : > { %645 = vst [vmem:[%s1360_s13 + $0x20] sm:$0xf] %v612_v11  ;;  %v677_v13 = vsel %vm651_vm2, %v612_v11, 0  ;;  %1085 = vmatmul.mubr.msk.bf16.vlgmr.msra.gmra.mxu0 %vm647_vm3, %v646_v56 }
 0x102   : > { %v601_v14 = vpop.f32.mrf.mxu0  ;;  %1119 = vmatpush3.bf16.msra.mxu1 %v677_v13 }
 0x104   : > { %v1117_v15 = vpop.f32.mrf.mxu0 }
 0x107   : > { %1121 = vmatmul.mubr.msk.bf16.vlgmr.msra.gmra.mxu1 %vm647_vm3, %v646_v56 }
 0x1b7   : > { %v713_v16 = vpop.f32.mrf.mxu1  ;;  %v754_v18 = vpop.f32.mrf.mxu0 }
 0x1b8   : > { %v883_v19 = vmax.f32 %v713_v16, 0.0  ;;  %v885_v21 = vmax.f32 %v754_v18, 0.0 }
 0x1b9   : > { %v715_v17 = vpop.f32.mrf.mxu1  ;;  %v756_v23 = vpop.f32.mrf.mxu0 }
 0x1ba   : > { %v884_v20 = vmax.f32 %v715_v17, 0.0  ;;  %v886_v25 = vmax.f32 %v756_v23, 0.0 }
 0x1bb   : > { %v717_v22 = vpop.f32.mrf.mxu1  ;;  %v758_v27 = vpop.f32.mrf.mxu0 }
 0x1bc   : > { %v1100_v24 = vpack.c.bf16 %v884_v20, %v883_v19  ;;  %v1101_v28 = vpack.c.bf16 %v886_v25, %v885_v21 }
 0x1bd   : > { %v718_v26 = vpop.f32.mrf.mxu1  ;;  %v759_v30 = vpop.f32.mrf.mxu0 }
 0x1be   : > { %929 = vst [vmem:[%s1394_s20] sm:$0xff] %v1100_v24  ;;  %930 = vst [vmem:[%s1394_s20 + $0x8] sm:$0xff] %v1101_v28 }
 0x1bf   : > { %v795_v29 = vpop.f32.mrf.mxu1 }
 0x1c0   : > { %v887_v33 = vmax.f32 %v795_v29, 0.0 }
 0x1c1   : > { %v797_v31 = vpop.f32.mrf.mxu1  ;;  %v836_v32 = vpop.f32.mrf.mxu0 }
 0x1c2   : > { %v888_v34 = vmax.f32 %v797_v31, 0.0  ;;  %v889_v35 = vmax.f32 %v836_v32, 0.0 }
 0x1c3   : > { %v799_v36 = vpop.f32.mrf.mxu1  ;;  %v838_v37 = vpop.f32.mrf.mxu0 }
 0x1c4   : > { %v1102_v38 = vpack.c.bf16 %v888_v34, %v887_v33  ;;  %v890_v39 = vmax.f32 %v838_v37, 0.0 }
 0x1c5   : > { %v800_v40 = vpop.f32.mrf.mxu1  ;;  %v840_v41 = vpop.f32.mrf.mxu0 }
 0x1c6   : > { %931 = vst [vmem:[%s1394_s20 + $0x10] sm:$0xff] %v1102_v38  ;;  %v1103_v42 = vpack.c.bf16 %v890_v39, %v889_v35 }
 0x1c7   : > { %v877_v43 = vpop.f32.mrf.mxu1  ;;  %v841_v44 = vpop.f32.mrf.mxu0 }
 0x1c8   : > { %932 = vst [vmem:[%s1394_s20 + $0x18] sm:$0xff] %v1103_v42  ;;  %v891_v45 = vmax.f32 %v877_v43, 0.0 }
 0x1c9   : > { %v1122_v46 = vpop.f32.mrf.mxu1 }
 0x1ca   : > { %v1104_v47 = vpack.c.bf16 %v891_v45, %v891_v45 }
 0x1cb   : > { %v880_v48 = vpop.f32.mrf.mxu1 }
 0x1cc   : > { %933 = vst [vmem:[%s1394_s20 + $0x20] sm:$0xf] %v1104_v47 }
 0x1cd   : > { %v1123_v49 = vpop.f32.mrf.mxu1 }
 0x1ce PF: > { %p12_p9 = scmp.ge.s32.totalorder %s1248_s19, 4   ;;  %s1416_s15 = smov %s1197_s16 }
 0x1cf   : > { %s1417_s16 = smov %s1257_s22  ;;  %s1418_s17 = smov %s1248_s19 }
 0x1d0   :  { %14 = sbr.rel (!%p12_p9) target bundleno = 2 (0x2), region = 111 }

// kernel: clf_img_forward.6
= control target key start
LH: loop header
LB: loop body
LE: loop exit
PB: predicated region body
PF: predicated region fallthrough
CT: control target
= control target key end

     0   :  { %vm534_vm0 = vcmask 130048   ;;  %s1105_s0 = inlined_call_operand.vmem [shape: bf16[256,512], index: 0, kind: input, shape index: {}]   ;;  %s1106_s1 = inlined_call_operand.vmem [shape: bf16[16,256], index: 1, kind: input, shape index: {}]   ;;  %s1107_s2 = inlined_call_operand.vmem [shape: bf16[16,16], index: 2, kind: input, shape index: {}]   ;;  %s1108_s3 = inlined_call_operand.vmem [shape: bf16[16,512], index: 3, kind: output, shape index: {0}]   ;;  %s1109_s4 = inlined_call_operand.vmem [shape: bf16[16,512], index: 4, kind: output, shape index: {1}]  }
   0x1   :  { %v754_v0 = vld [vmem:[%s1105_s0 + $0xe4] ss:$16 sps:$4 sm:$0xff]   ;;  %v756_v1 = vld [vmem:[%s1105_s0 + $0xec] ss:$16 sps:$4 sm:$0xff]   ;;  %v758_v2 = vld [vmem:[%s1105_s0 + $0xe0] ss:$16 sps:$4 sm:$0xff]  }
   0x2   :  { %413 = vmatprep.subr.bf16.mxu0 %v754_v0  ;;  %v759_v3 = vld [vmem:[%s1105_s0 + $0xe8] ss:$16 sps:$4 sm:$0xff]   ;;  %456 = vmatprep.subr.bf16.mxu1 %v756_v1  ;;  %v760_v4 = vld [vmem:[%s1105_s0 + $0xc4] ss:$16 sps:$4 sm:$0xff]   ;;  %v762_v5 = vld [vmem:[%s1105_s0 + $0xcc] ss:$16 sps:$4 sm:$0xff]  }
   0x3   :  { %414 = vmatpush1.bf16.msra.mxu0 %v758_v2  ;;  %457 = vmatpush1.bf16.msra.mxu1 %v759_v3  ;;  %v764_v6 = vld [vmem:[%s1105_s0 + $0xc0] ss:$16 sps:$4 sm:$0xff]   ;;  %v765_v7 = vld [vmem:[%s1105_s0 + $0xc8] ss:$16 sps:$4 sm:$0xff]   ;;  %v766_v8 = vld [vmem:[%s1105_s0 + $0xa4] ss:$16 sps:$4 sm:$0xff]  }
   0x4   :  { %415 = vmatprep.subr.bf16.mxu0 %v760_v4  ;;  %458 = vmatprep.subr.bf16.mxu1 %v762_v5  ;;  %v768_v9 = vld [vmem:[%s1105_s0 + $0xac] ss:$16 sps:$4 sm:$0xff]   ;;  %v770_v10 = vld [vmem:[%s1105_s0 + $0xa0] ss:$16 sps:$4 sm:$0xff]   ;;  %v771_v11 = vld [vmem:[%s1105_s0 + $0xa8] ss:$16 sps:$4 sm:$0xff]  }
   0x5   :  { %v772_v12 = vld [vmem:[%s1105_s0 + $0x84] ss:$16 sps:$4 sm:$0xff]   ;;  %v774_v13 = vld [vmem:[%s1105_s0 + $0x8c] ss:$16 sps:$4 sm:$0xff]   ;;  %v776_v14 = vld [vmem:[%s1105_s0 + $0x80] ss:$16 sps:$4 sm:$0xff]  }
   0x6   :  { %v777_v15 = vld [vmem:[%s1105_s0 + $0x88] ss:$16 sps:$4 sm:$0xff]   ;;  %v778_v16 = vld [vmem:[%s1105_s0 + $0x64] ss:$16 sps:$4 sm:$0xff]   ;;  %v780_v17 = vld [vmem:[%s1105_s0 + $0x6c] ss:$16 sps:$4 sm:$0xff]  }
   0x7   :  { %416 = vmatpush1.bf16.msra.mxu0 %v764_v6  ;;  %459 = vmatpush1.bf16.msra.mxu1 %v765_v7  ;;  %v782_v18 = vld [vmem:[%s1105_s0 + $0x60] ss:$16 sps:$4 sm:$0xff]   ;;  %v783_v19 = vld [vmem:[%s1105_s0 + $0x68] ss:$16 sps:$4 sm:$0xff]   ;;  %v784_v20 = vld [vmem:[%s1105_s0 + $0x44] ss:$16 sps:$4 sm:$0xff]  }
   0x8   :  { %417 = vmatprep.subr.bf16.mxu0 %v766_v8  ;;  %460 = vmatprep.subr.bf16.mxu1 %v768_v9  ;;  %v786_v21 = vld [vmem:[%s1105_s0 + $0x4c] ss:$16 sps:$4 sm:$0xff]   ;;  %v788_v22 = vld [vmem:[%s1105_s0 + $0x40] ss:$16 sps:$4 sm:$0xff]   ;;  %v789_v23 = vld [vmem:[%s1105_s0 + $0x48] ss:$16 sps:$4 sm:$0xff]  }
   0x9   :  { %v790_v24 = vld [vmem:[%s1105_s0 + $0x24] ss:$16 sps:$4 sm:$0xff]   ;;  %v792_v25 = vld [vmem:[%s1105_s0 + $0x2c] ss:$16 sps:$4 sm:$0xff]   ;;  %v794_v26 = vld [vmem:[%s1105_s0 + $0x20] ss:$16 sps:$4 sm:$0xff]  }
   0xa   :  { %v795_v27 = vld [vmem:[%s1105_s0 + $0x28] ss:$16 sps:$4 sm:$0xff]   ;;  %v796_v28 = vld [vmem:[%s1105_s0 + $0x4] ss:$16 sps:$4 sm:$0xff]   ;;  %v798_v29 = vld [vmem:[%s1105_s0 + $0xc] ss:$16 sps:$4 sm:$0xff]  }
   0xb   :  { %418 = vmatpush1.bf16.msra.mxu0 %v770_v10  ;;  %461 = vmatpush1.bf16.msra.mxu1 %v771_v11  ;;  %v800_v30 = vld [vmem:[%s1105_s0] ss:$16 sps:$4 sm:$0xff]   ;;  %v801_v31 = vld [vmem:[%s1105_s0 + $0x8] ss:$16 sps:$4 sm:$0xff]   ;;  %v802_v32 = vld [vmem:[%s1105_s0 + $0x1e4] ss:$16 sps:$4 sm:$0xff]  }
   0xc   :  { %419 = vmatprep.subr.bf16.mxu0 %v772_v12  ;;  %462 = vmatprep.subr.bf16.mxu1 %v774_v13  ;;  %v804_v33 = vld [vmem:[%s1105_s0 + $0x1ec] ss:$16 sps:$4 sm:$0xff]   ;;  %v806_v34 = vld [vmem:[%s1105_s0 + $0x1e0] ss:$16 sps:$4 sm:$0xff]   ;;  %v807_v35 = vld [vmem:[%s1105_s0 + $0x1e8] ss:$16 sps:$4 sm:$0xff]  }
   0xd   :  { %v808_v36 = vld [vmem:[%s1105_s0 + $0x1c4] ss:$16 sps:$4 sm:$0xff]   ;;  %v810_v37 = vld [vmem:[%s1105_s0 + $0x1cc] ss:$16 sps:$4 sm:$0xff]   ;;  %v812_v38 = vld [vmem:[%s1105_s0 + $0x1c0] ss:$16 sps:$4 sm:$0xff]  }
   0xe   :  { %v813_v39 = vld [vmem:[%s1105_s0 + $0x1c8] ss:$16 sps:$4 sm:$0xff]   ;;  %v814_v40 = vld [vmem:[%s1105_s0 + $0x1a4] ss:$16 sps:$4 sm:$0xff]   ;;  %v816_v41 = vld [vmem:[%s1105_s0 + $0x1ac] ss:$16 sps:$4 sm:$0xff]  }
   0xf   :  { %420 = vmatpush1.bf16.msra.mxu0 %v776_v14  ;;  %463 = vmatpush1.bf16.msra.mxu1 %v777_v15  ;;  %v818_v42 = vld [vmem:[%s1105_s0 + $0x1a0] ss:$16 sps:$4 sm:$0xff]   ;;  %v819_v43 = vld [vmem:[%s1105_s0 + $0x1a8] ss:$16 sps:$4 sm:$0xff]   ;;  %v820_v44 = vld [vmem:[%s1105_s0 + $0x184] ss:$16 sps:$4 sm:$0xff]  }
  0x10   :  { %421 = vmatprep.subr.bf16.mxu0 %v778_v16  ;;  %464 = vmatprep.subr.bf16.mxu1 %v780_v17  ;;  %v822_v45 = vld [vmem:[%s1105_s0 + $0x18c] ss:$16 sps:$4 sm:$0xff]   ;;  %v824_v47 = vld [vmem:[%s1105_s0 + $0x180] ss:$16 sps:$4 sm:$0xff]   ;;  %v825_v48 = vld [vmem:[%s1105_s0 + $0x188] ss:$16 sps:$4 sm:$0xff]  }
  0x11   :  { %v852_v46 = vld [vmem:[%s1106_s1 + $0x4] ss:$8 sps:$4 sm:$0xff]   ;;  %v830_v51 = vld [vmem:[%s1105_s0 + $0x160] ss:$16 sps:$4 sm:$0xff]   ;;  %v831_v52 = vld [vmem:[%s1105_s0 + $0x168] ss:$16 sps:$4 sm:$0xff]  }
  0x12   :  { %v826_v49 = vld [vmem:[%s1105_s0 + $0x164] ss:$16 sps:$4 sm:$0xff]   ;;  %v828_v50 = vld [vmem:[%s1105_s0 + $0x16c] ss:$16 sps:$4 sm:$0xff]   ;;  %445 = vmatprep.mubr.bf16.mxu0 %v852_v46  ;;  %488 = vmatprep.mubr.bf16.mxu1 %v852_v46  ;;  %v836_v55 = vld [vmem:[%s1105_s0 + $0x140] ss:$16 sps:$4 sm:$0xff]  }
  0x13   :  { %422 = vmatpush1.bf16.msra.mxu0 %v782_v18  ;;  %465 = vmatpush1.bf16.msra.mxu1 %v783_v19  ;;  %v832_v53 = vld [vmem:[%s1105_s0 + $0x144] ss:$16 sps:$4 sm:$0xff]   ;;  %v834_v54 = vld [vmem:[%s1105_s0 + $0x14c] ss:$16 sps:$4 sm:$0xff]   ;;  %v837_v56 = vld [vmem:[%s1105_s0 + $0x148] ss:$16 sps:$4 sm:$0xff]  }
  0x14   :  { %423 = vmatprep.subr.bf16.mxu0 %v784_v20  ;;  %466 = vmatprep.subr.bf16.mxu1 %v786_v21  ;;  %v838_v57 = vld [vmem:[%s1105_s0 + $0x124] ss:$16 sps:$4 sm:$0xff]   ;;  %v840_v58 = vld [vmem:[%s1105_s0 + $0x12c] ss:$16 sps:$4 sm:$0xff]   ;;  %v842_v59 = vld [vmem:[%s1105_s0 + $0x120] ss:$16 sps:$4 sm:$0xff]  }
  0x15   :  { %v843_v60 = vld [vmem:[%s1105_s0 + $0x128] ss:$16 sps:$4 sm:$0xff]   ;;  %v844_v61 = vld [vmem:[%s1105_s0 + $0x104] ss:$16 sps:$4 sm:$0xff]   ;;  %v846_v62 = vld [vmem:[%s1105_s0 + $0x10c] ss:$16 sps:$4 sm:$0xff]  }
  0x16   :  { %v848_v63 = vld [vmem:[%s1105_s0 + $0x100] ss:$16 sps:$4 sm:$0xff]   ;;  %v849_v0 = vld [vmem:[%s1105_s0 + $0x108] ss:$16 sps:$4 sm:$0xff]   ;;  %v854_v2 = vmov 0  }
  0x17   :  { %424 = vmatpush1.bf16.msra.mxu0 %v788_v22  ;;  %467 = vmatpush1.bf16.msra.mxu1 %v789_v23  ;;  %v850_v1 = vld [vmem:[%s1106_s1] ss:$8 sps:$4 sm:$0xff]  }
  0x18   :  { %425 = vmatprep.subr.bf16.mxu0 %v790_v24  ;;  %468 = vmatprep.subr.bf16.mxu1 %v792_v25  ;;  %v853_v19 = vld [vmem:[%s1107_s2] sm:$0xff]  }
  0x1b   :  { %426 = vmatpush1.bf16.msra.mxu0 %v794_v26  ;;  %469 = vmatpush1.bf16.msra.mxu1 %v795_v27 }
  0x1c   :  { %427 = vmatprep.subr.bf16.mxu0 %v796_v28  ;;  %470 = vmatprep.subr.bf16.mxu1 %v798_v29 }
  0x1f   :  { %428 = vmatpush1.bf16.msra.mxu0 %v800_v30  ;;  %471 = vmatpush1.bf16.msra.mxu1 %v801_v31 }
  0x20   :  { %429 = vmatprep.subr.bf16.mxu0 %v802_v32  ;;  %472 = vmatprep.subr.bf16.mxu1 %v804_v33 }
  0x23   :  { %430 = vmatpush2.bf16.msra.mxu0 %v806_v34  ;;  %473 = vmatpush2.bf16.msra.mxu1 %v807_v35 }
  0x24   :  { %431 = vmatprep.subr.bf16.mxu0 %v808_v36  ;;  %474 = vmatprep.subr.bf16.mxu1 %v810_v37 }
  0x27   :  { %432 = vmatpush2.bf16.msra.mxu0 %v812_v38  ;;  %475 = vmatpush2.bf16.msra.mxu1 %v813_v39 }
  0x28   :  { %433 = vmatprep.subr.bf16.mxu0 %v814_v40  ;;  %476 = vmatprep.subr.bf16.mxu1 %v816_v41 }
  0x2b   :  { %434 = vmatpush2.bf16.msra.mxu0 %v818_v42  ;;  %477 = vmatpush2.bf16.msra.mxu1 %v819_v43 }
  0x2c   :  { %435 = vmatprep.subr.bf16.mxu0 %v820_v44  ;;  %478 = vmatprep.subr.bf16.mxu1 %v822_v45 }
  0x2f   :  { %436 = vmatpush2.bf16.msra.mxu0 %v824_v47  ;;  %479 = vmatpush2.bf16.msra.mxu1 %v825_v48 }
  0x30   :  { %437 = vmatprep.subr.bf16.mxu0 %v826_v49  ;;  %480 = vmatprep.subr.bf16.mxu1 %v828_v50 }
  0x33   :  { %438 = vmatpush2.bf16.msra.mxu0 %v830_v51  ;;  %481 = vmatpush2.bf16.msra.mxu1 %v831_v52 }
  0x34   :  { %439 = vmatprep.subr.bf16.mxu0 %v832_v53  ;;  %482 = vmatprep.subr.bf16.mxu1 %v834_v54 }
  0x37   :  { %440 = vmatpush2.bf16.msra.mxu0 %v836_v55  ;;  %483 = vmatpush2.bf16.msra.mxu1 %v837_v56 }
  0x38   :  { %441 = vmatprep.subr.bf16.mxu0 %v838_v57  ;;  %484 = vmatprep.subr.bf16.mxu1 %v840_v58 }
  0x3b   :  { %442 = vmatpush2.bf16.msra.mxu0 %v842_v59  ;;  %485 = vmatpush2.bf16.msra.mxu1 %v843_v60 }
  0x3c   :  { %443 = vmatprep.subr.bf16.mxu0 %v844_v61  ;;  %486 = vmatprep.subr.bf16.mxu1 %v846_v62 }
  0x3f   :  { %444 = vmatpush2.bf16.msra.mxu0 %v848_v63  ;;  %487 = vmatpush2.bf16.msra.mxu1 %v849_v0 }
  0x42   :  { %446 = vmatmul.mubr.bf16.vlgmr.msra.gmra.mxu0 %v850_v1  ;;  %489 = vmatmul.mubr.bf16.vlgmr.msra.gmra.mxu1 %v850_v1 }
  0x43   :  { %570 = vmatprep.mubr.bf16.mxu0 %v854_v2  ;;  %613 = vmatprep.mubr.bf16.mxu1 %v854_v2 }
 0x102   :  { %v447_v3 = vpop.f32.mrf.mxu0  ;;  %v490_v4 = vpop.f32.mrf.mxu1 }
 0x104   :  { %v449_v5 = vpop.f32.mrf.mxu0  ;;  %v492_v6 = vpop.f32.mrf.mxu1 }
 0x105   :  { %v745_v7 = vpack.c.bf16 %v449_v5, %v447_v3  ;;  %v746_v8 = vpack.c.bf16 %v492_v6, %v490_v4 }
 0x106   :  { %v451_v9 = vpop.f32.mrf.mxu0  ;;  %v494_v10 = vpop.f32.mrf.mxu1 }
 0x107   :  { %523 = vst [vmem:[%s1108_s3] sm:$0xff] %v745_v7  ;;  %524 = vst [vmem:[%s1108_s3 + $0x8] sm:$0xff] %v746_v8  ;;  %v499_v17 = vpack.c.bf16 %v451_v9, %v447_v3  ;;  %v501_v18 = vpack.c.bf16 %v494_v10, %v490_v4 }
 0x108   :  { %v453_v11 = vpop.f32.mrf.mxu0  ;;  %v496_v12 = vpop.f32.mrf.mxu1 }
 0x109   :  { %v500_v13 = vpack.c.bf16 %v453_v11, %v449_v5  ;;  %v747_v14 = vpack.c.bf16 %v453_v11, %v451_v9  ;;  %v502_v15 = vpack.c.bf16 %v496_v12, %v492_v6  ;;  %v748_v16 = vpack.c.bf16 %v496_v12, %v494_v10 }
 0x10b   :  { %525 = vst [vmem:[%s1108_s3 + $0x10] sm:$0xff] %v747_v14  ;;  %526 = vst [vmem:[%s1108_s3 + $0x18] sm:$0xff] %v748_v16  ;;  %552 = vmatprep.subr.bf16.mxu0 %v500_v13  ;;  %595 = vmatprep.subr.bf16.mxu1 %v502_v15 }
 0x10c   :  { %553 = vmatpush1.bf16.msra.mxu0 %v499_v17  ;;  %596 = vmatpush1.bf16.msra.mxu1 %v501_v18 }
 0x10f   :  { %739 = vmatmul.mubr.msk.bf16.vlgmr.msra.gmra.mxu0 %vm534_vm0, %v853_v19  ;;  %740 = vmatmul.mubr.msk.bf16.vlgmr.msra.gmra.mxu1 %vm534_vm0, %v853_v19 }
 0x1cf   :  { %v572_v20 = vpop.f32.mrf.mxu0  ;;  %v615_v21 = vpop.f32.mrf.mxu1 }
 0x1d0   :  { %v624_v24 = vmax.f32 %v572_v20, 0.0  ;;  %v626_v25 = vmax.f32 %v615_v21, 0.0 }
 0x1d1   :  { %v574_v22 = vpop.f32.mrf.mxu0  ;;  %v617_v23 = vpop.f32.mrf.mxu1 }
 0x1d2   :  { %v625_v26 = vmax.f32 %v574_v22, 0.0  ;;  %v627_v27 = vmax.f32 %v617_v23, 0.0 }
 0x1d3   :  { %v576_v28 = vpop.f32.mrf.mxu0  ;;  %v619_v29 = vpop.f32.mrf.mxu1 }
 0x1d4   :  { %v749_v30 = vpack.c.bf16 %v625_v26, %v624_v24  ;;  %v750_v31 = vpack.c.bf16 %v627_v27, %v626_v25  ;;  %v628_v34 = vmax.f32 %v576_v28, 0.0  ;;  %v630_v35 = vmax.f32 %v619_v29, 0.0 }
 0x1d5   :  { %v578_v32 = vpop.f32.mrf.mxu0  ;;  %v621_v33 = vpop.f32.mrf.mxu1 }
 0x1d6   :  { %656 = vst [vmem:[%s1109_s4] sm:$0xff] %v749_v30  ;;  %657 = vst [vmem:[%s1109_s4 + $0x8] sm:$0xff] %v750_v31  ;;  %v629_v36 = vmax.f32 %v578_v32, 0.0  ;;  %v631_v37 = vmax.f32 %v621_v33, 0.0 }
 0x1d8   :  { %v751_v38 = vpack.c.bf16 %v629_v36, %v628_v34  ;;  %v752_v39 = vpack.c.bf16 %v631_v37, %v630_v35 }
 0x1da   :  { %658 = vst [vmem:[%s1109_s4 + $0x10] sm:$0xff] %v751_v38  ;;  %659 = vst [vmem:[%s1109_s4 + $0x18] sm:$0xff] %v752_v39 }

// kernel: clf_img_forward.7
= control target key start
LH: loop header
LB: loop body
LE: loop exit
PB: predicated region body
PF: predicated region fallthrough
CT: control target
= control target key end

     0   :  { %vm436_vm0 = vcmask 195584   ;;  %vm443_vm1 = vcmask 1043456   ;;  %s860_s0 = inlined_call_operand.vmem [shape: bf16[512,128], index: 0, kind: input, shape index: {}]   ;;  %s861_s1 = inlined_call_operand.vmem [shape: bf16[24,512], index: 1, kind: input, shape index: {}]   ;;  %s862_s2 = inlined_call_operand.vmem [shape: bf16[24,24], index: 2, kind: input, shape index: {}]   ;;  %s863_s3 = inlined_call_operand.vmem [shape: bf16[24,128], index: 3, kind: output, shape index: {0}]   ;;  %s864_s4 = inlined_call_operand.vmem [shape: bf16[24,128], index: 4, kind: output, shape index: {1}]  }
   0x1   :  { %v657_v0 = vld [vmem:[%s860_s0 + $0x78] sm:$0xff]   ;;  %v661_v4 = vld [vmem:[%s860_s0 + $0x70] sm:$0xff]   ;;  %v665_v8 = vld [vmem:[%s860_s0 + $0x68] sm:$0xff]  }
   0x2   :  { %v658_v1 = vld [vmem:[%s860_s0 + $0xf8] sm:$0xff]   ;;  %588 = vmatprep.subr.bf16.mxu0 %v657_v0  ;;  %v662_v5 = vld [vmem:[%s860_s0 + $0xf0] sm:$0xff]   ;;  %v666_v9 = vld [vmem:[%s860_s0 + $0xe8] sm:$0xff]  }
   0x3   :  { %v659_v2 = vld [vmem:[%s860_s0 + $0x38] sm:$0xff]   ;;  %616 = vmatprep.subr.bf16.mxu1 %v658_v1  ;;  %v663_v6 = vld [vmem:[%s860_s0 + $0x30] sm:$0xff]   ;;  %v667_v10 = vld [vmem:[%s860_s0 + $0x28] sm:$0xff]  }
   0x4   :  { %v660_v3 = vld [vmem:[%s860_s0 + $0xb8] sm:$0xff]   ;;  %589 = vmatpush3.bf16.msra.mxu0 %v659_v2  ;;  %v664_v7 = vld [vmem:[%s860_s0 + $0xb0] sm:$0xff]   ;;  %v668_v11 = vld [vmem:[%s860_s0 + $0xa8] sm:$0xff]  }
   0x5   :  { %617 = vmatpush3.bf16.msra.mxu1 %v660_v3  ;;  %590 = vmatprep.subr.bf16.mxu0 %v661_v4  ;;  %v669_v12 = vld [vmem:[%s860_s0 + $0x60] sm:$0xff]   ;;  %v673_v16 = vld [vmem:[%s860_s0 + $0x58] sm:$0xff]   ;;  %v677_v20 = vld [vmem:[%s860_s0 + $0x50] sm:$0xff]  }
   0x6   :  { %618 = vmatprep.subr.bf16.mxu1 %v662_v5  ;;  %v670_v13 = vld [vmem:[%s860_s0 + $0xe0] sm:$0xff]   ;;  %v674_v17 = vld [vmem:[%s860_s0 + $0xd8] sm:$0xff]   ;;  %v678_v21 = vld [vmem:[%s860_s0 + $0xd0] sm:$0xff]  }
   0x7   :  { %v671_v14 = vld [vmem:[%s860_s0 + $0x20] sm:$0xff]   ;;  %v675_v18 = vld [vmem:[%s860_s0 + $0x18] sm:$0xff]   ;;  %v679_v22 = vld [vmem:[%s860_s0 + $0x10] sm:$0xff]  }
   0x8   :  { %591 = vmatpush3.bf16.msra.mxu0 %v663_v6  ;;  %v672_v15 = vld [vmem:[%s860_s0 + $0xa0] sm:$0xff]   ;;  %v676_v19 = vld [vmem:[%s860_s0 + $0x98] sm:$0xff]   ;;  %v680_v23 = vld [vmem:[%s860_s0 + $0x90] sm:$0xff]  }
   0x9   :  { %619 = vmatpush3.bf16.msra.mxu1 %v664_v7  ;;  %592 = vmatprep.subr.bf16.mxu0 %v665_v8  ;;  %v681_v24 = vld [vmem:[%s860_s0 + $0x48] sm:$0xff]   ;;  %v685_v28 = vld [vmem:[%s860_s0 + $0x40] sm:$0xff]  }
   0xa   :  { %620 = vmatprep.subr.bf16.mxu1 %v666_v9  ;;  %v682_v25 = vld [vmem:[%s860_s0 + $0xc8] sm:$0xff]   ;;  %v686_v29 = vld [vmem:[%s860_s0 + $0xc0] sm:$0xff]  }
   0xb   :  { %v683_v26 = vld [vmem:[%s860_s0 + $0x8] sm:$0xff]   ;;  %v687_v30 = vld [vmem:[%s860_s0] sm:$0xff]  }
   0xc   :  { %593 = vmatpush3.bf16.msra.mxu0 %v667_v10  ;;  %v684_v27 = vld [vmem:[%s860_s0 + $0x88] sm:$0xff]   ;;  %v688_v31 = vld [vmem:[%s860_s0 + $0x80] sm:$0xff]  }
   0xd   :  { %621 = vmatpush3.bf16.msra.mxu1 %v668_v11  ;;  %594 = vmatprep.subr.bf16.mxu0 %v669_v12  ;;  %v689_v32 = vld [vmem:[%s861_s1] ss:$16 sps:$4 sm:$0xff]   ;;  %v691_v33 = vld [vmem:[%s861_s1 + $0x4] ss:$16 sps:$4 sm:$0xff]   ;;  %v692_v34 = vld [vmem:[%s861_s1 + $0x8] ss:$16 sps:$4 sm:$0xff]  }
   0xe   :  { %622 = vmatprep.subr.bf16.mxu1 %v670_v13  ;;  %v694_v35 = vld [vmem:[%s861_s1 + $0xc] ss:$16 sps:$4 sm:$0xff]   ;;  %v21_v36 = vld [vmem:[%s861_s1 + $0x20] sm:$0xff]  ;;  %345 = vmatprep.mubr.bf16.mxu0 %v691_v33  ;;  %v700_v7 = vld [vmem:[%s862_s2 + $0x8] ss:$0 sps:$4 sm:$0xff]  }
   0xf   :  { %v527_v37 = vcombine.high %v21_v36, %v21_v36  ;;  %v22_v38 = vld [vmem:[%s861_s1 + $0x28] sm:$0xff]  ;;  %393 = vmatprep.mubr.bf16.mxu1 %v694_v35  ;;  %v526_v40 = vcombine.low %v21_v36, %v21_v36  ;;  %v699_v42 = vld [vmem:[%s862_s2] sm:$0xff]  }
  0x10   :  { %595 = vmatpush3.bf16.msra.mxu0 %v671_v14  ;;  %v529_v39 = vcombine.high %v22_v38, %v22_v38  ;;  %v528_v41 = vcombine.low %v22_v38, %v22_v38 }
  0x11   :  { %623 = vmatpush3.bf16.msra.mxu1 %v672_v15  ;;  %596 = vmatprep.subr.bf16.mxu0 %v673_v16 }
  0x12   :  { %624 = vmatprep.subr.bf16.mxu1 %v674_v17 }
  0x14   :  { %597 = vmatpush3.bf16.msra.mxu0 %v675_v18 }
  0x15   :  { %625 = vmatpush3.bf16.msra.mxu1 %v676_v19  ;;  %598 = vmatprep.subr.bf16.mxu0 %v677_v20 }
  0x16   :  { %626 = vmatprep.subr.bf16.mxu1 %v678_v21 }
  0x18   :  { %599 = vmatpush3.bf16.msra.mxu0 %v679_v22 }
  0x19   :  { %627 = vmatpush3.bf16.msra.mxu1 %v680_v23  ;;  %600 = vmatprep.subr.bf16.mxu0 %v681_v24 }
  0x1a   :  { %628 = vmatprep.subr.bf16.mxu1 %v682_v25 }
  0x1c   :  { %601 = vmatpush3.bf16.msra.mxu0 %v683_v26 }
  0x1d   :  { %629 = vmatpush3.bf16.msra.mxu1 %v684_v27  ;;  %602 = vmatprep.subr.bf16.mxu0 %v685_v28 }
  0x1e   :  { %630 = vmatprep.subr.bf16.mxu1 %v686_v29 }
  0x20   :  { %603 = vmatpush3.bf16.msra.mxu0 %v687_v30 }
  0x21   :  { %631 = vmatpush3.bf16.msra.mxu1 %v688_v31 }
  0x23   :  { %346 = vmatmul.mubr.bf16.vlgmr.msra.gmra.mxu0 %v689_v32 }
  0x24   :  { %394 = vmatmul.mubr.bf16.vlgmr.msra.gmra.mxu1 %v692_v34  ;;  %353 = vmatprep.mubr.bf16.mxu0 %v527_v37 }
  0x25   :  { %401 = vmatprep.mubr.bf16.mxu1 %v529_v39 }
  0x2b   :  { %354 = vmatmul.mubr.bf16.gmra.mxu0 %v526_v40 }
  0x2c   :  { %402 = vmatmul.mubr.bf16.gmra.mxu1 %v528_v41  ;;  %652 = vmatprep.mubr.msk.bf16.mxu0 %vm436_vm0, %v699_v42 }
  0xe3   :  { %v604_v43 = vpop.f32.mrf.mxu0 }
  0xe4   :  { %v632_v44 = vpop.f32.mrf.mxu1 }
  0xe5   :  { %v605_v45 = vpop.f32.mrf.mxu0 }
  0xe6   :  { %v633_v46 = vpop.f32.mrf.mxu1  ;;  %v606_v49 = vadd.f32 %v605_v45, %v604_v43 }
  0xe7   :  { %v607_v47 = vpop.f32.mrf.mxu0  ;;  %v634_v50 = vadd.f32 %v633_v46, %v632_v44 }
  0xe8   :  { %v635_v48 = vpop.f32.mrf.mxu1 }
  0xe9   :  { %v608_v51 = vpop.f32.mrf.mxu0  ;;  %v396_v57 = vadd.f32 %v634_v50, %v606_v49 }
  0xea   :  { %v609_v52 = vadd.f32 %v608_v51, %v607_v47  ;;  %v636_v53 = vpop.f32.mrf.mxu1 }
  0xeb   :  { %v637_v54 = vadd.f32 %v636_v53, %v635_v48  ;;  %v610_v55 = vpop.f32.mrf.mxu0 }
  0xec   :  { %v638_v56 = vpop.f32.mrf.mxu1 }
  0xed   :  { %v399_v58 = vadd.f32 %v637_v54, %v609_v52  ;;  %v611_v59 = vpop.f32.mrf.mxu0 }
  0xee   :  { %v612_v60 = vadd.f32 %v611_v59, %v610_v55  ;;  %v639_v61 = vpop.f32.mrf.mxu1 }
  0xef   :  { %v640_v62 = vadd.f32 %v639_v61, %v638_v56  ;;  %v613_v63 = vpop.f32.mrf.mxu0  ;;  %v409_v0 = vpack.c.bf16 %v399_v58, %v396_v57 }
  0xf0   :  { %v641_v1 = vpop.f32.mrf.mxu1 }
  0xf1   :  { %v404_v2 = vadd.f32 %v640_v62, %v612_v60  ;;  %v614_v3 = vpop.f32.mrf.mxu0  ;;  %582 = vst [vmem:[%s863_s3] sm:$0xff] %v409_v0  }
  0xf2   :  { %v642_v4 = vpop.f32.mrf.mxu1 }
  0xf3   :  { %v410_v5 = vpack.c.bf16 %v404_v2, %v404_v2 }
  0xf5   :  { %424 = vst [vmem:[%s863_s3 + $0x8] sm:$0xf] %v410_v5  ;;  %656 = vmatprep.subr.msk.bf16.mxu0 %vm443_vm1, %v410_v5  ;;  %v445_v6 = vsel %vm443_vm1, %v410_v5, 0 }
  0xf6   :  { %649 = vmatpush3.bf16.msra.mxu0 %v445_v6 }
  0xf7   :  { %650 = vmatprep.subr.bf16.mxu0 %v409_v0 }
  0xfa   :  { %651 = vmatpush3.bf16.msra.mxu0 %v409_v0 }
  0xfd   :  { %653 = vmatmul.mubr.msk.bf16.vlgmr.msra.gmra.mxu0 %vm436_vm0, %v700_v7 }
 0x1bd   :  { %v654_v8 = vpop.f32.mrf.mxu0 }
 0x1be   :  { %v497_v9 = vmax.f32 %v654_v8, 0.0 }
 0x1bf   :  { %v481_v10 = vpop.f32.mrf.mxu0 }
 0x1c0   :  { %v577_v11 = vpack.c.bf16 %v497_v9, %v497_v9  ;;  %v495_v14 = vmax.f32 %v481_v10, 0.0 }
 0x1c1   :  { %v655_v12 = vpop.f32.mrf.mxu0 }
 0x1c2   :  { %513 = vst [vmem:[%s864_s4 + $0x8] sm:$0xf] %v577_v11 }
 0x1c3   :  { %v484_v13 = vpop.f32.mrf.mxu0 }
 0x1c4   :  { %v496_v15 = vmax.f32 %v484_v13, 0.0 }
 0x1c6   :  { %v586_v16 = vpack.c.bf16 %v496_v15, %v495_v14 }
 0x1c8   :  { %587 = vst [vmem:[%s864_s4] sm:$0xff] %v586_v16  }

// kernel: clf_img_forward.8
= control target key start
LH: loop header
LB: loop body
LE: loop exit
PB: predicated region body
PF: predicated region fallthrough
CT: control target
= control target key end

     0   :  { %vm654_vm0 = vcmask 261120   ;;  %s1233_s0 = inlined_call_operand.vmem [shape: bf16[768,128], index: 0, kind: input, shape index: {}]   ;;  %s1234_s1 = inlined_call_operand.vmem [shape: bf16[32,768], index: 1, kind: input, shape index: {}]   ;;  %s1235_s2 = inlined_call_operand.vmem [shape: bf16[32,32], index: 2, kind: input, shape index: {}]   ;;  %s1236_s3 = inlined_call_operand.vmem [shape: bf16[32,128], index: 3, kind: output, shape index: {0}]   ;;  %s1237_s4 = inlined_call_operand.vmem [shape: bf16[32,128], index: 4, kind: output, shape index: {1}]  }
   0x1   :  { %v940_v0 = vld [vmem:[%s1233_s0 + $0x78] sm:$0xff]   ;;  %v944_v4 = vld [vmem:[%s1233_s0 + $0x70] sm:$0xff]   ;;  %v948_v8 = vld [vmem:[%s1233_s0 + $0x68] sm:$0xff]  }
   0x2   :  { %v941_v1 = vld [vmem:[%s1233_s0 + $0xf8] sm:$0xff]   ;;  %844 = vmatprep.subr.bf16.mxu0 %v940_v0  ;;  %v945_v5 = vld [vmem:[%s1233_s0 + $0xf0] sm:$0xff]   ;;  %v949_v9 = vld [vmem:[%s1233_s0 + $0xe8] sm:$0xff]  }
   0x3   :  { %v942_v2 = vld [vmem:[%s1233_s0 + $0x38] sm:$0xff]   ;;  %872 = vmatprep.subr.bf16.mxu1 %v941_v1  ;;  %v946_v6 = vld [vmem:[%s1233_s0 + $0x30] sm:$0xff]   ;;  %v950_v10 = vld [vmem:[%s1233_s0 + $0x28] sm:$0xff]  }
   0x4   :  { %v943_v3 = vld [vmem:[%s1233_s0 + $0xb8] sm:$0xff]   ;;  %845 = vmatpush3.bf16.msra.mxu0 %v942_v2  ;;  %v947_v7 = vld [vmem:[%s1233_s0 + $0xb0] sm:$0xff]   ;;  %v951_v11 = vld [vmem:[%s1233_s0 + $0xa8] sm:$0xff]  }
   0x5   :  { %873 = vmatpush3.bf16.msra.mxu1 %v943_v3  ;;  %846 = vmatprep.subr.bf16.mxu0 %v944_v4  ;;  %v952_v12 = vld [vmem:[%s1233_s0 + $0x60] sm:$0xff]   ;;  %v956_v16 = vld [vmem:[%s1233_s0 + $0x58] sm:$0xff]   ;;  %v960_v20 = vld [vmem:[%s1233_s0 + $0x50] sm:$0xff]  }
   0x6   :  { %874 = vmatprep.subr.bf16.mxu1 %v945_v5  ;;  %v953_v13 = vld [vmem:[%s1233_s0 + $0xe0] sm:$0xff]   ;;  %v957_v17 = vld [vmem:[%s1233_s0 + $0xd8] sm:$0xff]   ;;  %v961_v21 = vld [vmem:[%s1233_s0 + $0xd0] sm:$0xff]  }
   0x7   :  { %v954_v14 = vld [vmem:[%s1233_s0 + $0x20] sm:$0xff]   ;;  %v958_v18 = vld [vmem:[%s1233_s0 + $0x18] sm:$0xff]   ;;  %v962_v22 = vld [vmem:[%s1233_s0 + $0x10] sm:$0xff]  }
   0x8   :  { %847 = vmatpush3.bf16.msra.mxu0 %v946_v6  ;;  %v955_v15 = vld [vmem:[%s1233_s0 + $0xa0] sm:$0xff]   ;;  %v959_v19 = vld [vmem:[%s1233_s0 + $0x98] sm:$0xff]   ;;  %v963_v23 = vld [vmem:[%s1233_s0 + $0x90] sm:$0xff]  }
   0x9   :  { %875 = vmatpush3.bf16.msra.mxu1 %v947_v7  ;;  %848 = vmatprep.subr.bf16.mxu0 %v948_v8  ;;  %v964_v24 = vld [vmem:[%s1233_s0 + $0x48] sm:$0xff]   ;;  %v968_v28 = vld [vmem:[%s1233_s0 + $0x40] sm:$0xff]   ;;  %v978_v36 = vld [vmem:[%s1233_s0 + $0x178] sm:$0xff]  }
   0xa   :  { %876 = vmatprep.subr.bf16.mxu1 %v949_v9  ;;  %v965_v25 = vld [vmem:[%s1233_s0 + $0xc8] sm:$0xff]   ;;  %v969_v29 = vld [vmem:[%s1233_s0 + $0xc0] sm:$0xff]   ;;  %v979_v37 = vld [vmem:[%s1233_s0 + $0x138] sm:$0xff]  }
   0xb   :  { %v966_v26 = vld [vmem:[%s1233_s0 + $0x8] sm:$0xff]   ;;  %v970_v30 = vld [vmem:[%s1233_s0] sm:$0xff]   ;;  %v980_v38 = vld [vmem:[%s1233_s0 + $0x170] sm:$0xff]  }
   0xc   :  { %849 = vmatpush3.bf16.msra.mxu0 %v950_v10  ;;  %v967_v27 = vld [vmem:[%s1233_s0 + $0x88] sm:$0xff]   ;;  %v971_v31 = vld [vmem:[%s1233_s0 + $0x80] sm:$0xff]   ;;  %v981_v39 = vld [vmem:[%s1233_s0 + $0x130] sm:$0xff]  }
   0xd   :  { %877 = vmatpush3.bf16.msra.mxu1 %v951_v11  ;;  %850 = vmatprep.subr.bf16.mxu0 %v952_v12  ;;  %v972_v32 = vld [vmem:[%s1234_s1] ss:$24 sps:$4 sm:$0xff]   ;;  %v974_v33 = vld [vmem:[%s1234_s1 + $0x4] ss:$24 sps:$4 sm:$0xff]   ;;  %v982_v40 = vld [vmem:[%s1233_s0 + $0x168] sm:$0xff]  }
   0xe   :  { %878 = vmatprep.subr.bf16.mxu1 %v953_v13  ;;  %v975_v34 = vld [vmem:[%s1234_s1 + $0x8] ss:$24 sps:$4 sm:$0xff]   ;;  %v977_v35 = vld [vmem:[%s1234_s1 + $0xc] ss:$24 sps:$4 sm:$0xff]   ;;  %505 = vmatprep.mubr.bf16.mxu0 %v974_v33  ;;  %v989_v45 = vld [vmem:[%s1234_s1 + $0x3c] ss:$24 sps:$4 sm:$0xff]  }
   0xf   :  { %554 = vmatprep.mubr.bf16.mxu1 %v977_v35  ;;  %v983_v41 = vld [vmem:[%s1233_s0 + $0x128] sm:$0xff]   ;;  %v984_v42 = vld [vmem:[%s1233_s0 + $0x160] sm:$0xff]   ;;  %v986_v46 = vld [vmem:[%s1233_s0 + $0x158] sm:$0xff]  }
  0x10   :  { %851 = vmatpush3.bf16.msra.mxu0 %v954_v14  ;;  %v985_v43 = vld [vmem:[%s1233_s0 + $0x120] sm:$0xff]   ;;  %v987_v44 = vld [vmem:[%s1234_s1 + $0x34] ss:$24 sps:$4 sm:$0xff]   ;;  %v992_v47 = vld [vmem:[%s1234_s1 + $0x30] ss:$24 sps:$4 sm:$0xff]  }
  0x11   :  { %879 = vmatpush3.bf16.msra.mxu1 %v955_v15  ;;  %852 = vmatprep.subr.bf16.mxu0 %v956_v16  ;;  %v993_v48 = vld [vmem:[%s1234_s1 + $0x38] ss:$24 sps:$4 sm:$0xff]   ;;  %v1002_v52 = vld [vmem:[%s1234_s1 + $0x14] ss:$24 sps:$4 sm:$0xff]   ;;  %v998_v55 = vld [vmem:[%s1233_s0 + $0x140] sm:$0xff]  }
  0x12   :  { %880 = vmatprep.subr.bf16.mxu1 %v957_v17  ;;  %v991_v49 = vld [vmem:[%s1233_s0 + $0x118] sm:$0xff]   ;;  %v994_v50 = vld [vmem:[%s1233_s0 + $0x150] sm:$0xff]   ;;  %v996_v53 = vld [vmem:[%s1233_s0 + $0x148] sm:$0xff]  }
  0x13   :  { %v995_v51 = vld [vmem:[%s1233_s0 + $0x110] sm:$0xff]   ;;  %v997_v54 = vld [vmem:[%s1233_s0 + $0x108] sm:$0xff]   ;;  %v999_v56 = vld [vmem:[%s1233_s0 + $0x100] sm:$0xff]  }
  0x14   :  { %853 = vmatpush3.bf16.msra.mxu0 %v958_v18  ;;  %v1000_v57 = vld [vmem:[%s1234_s1 + $0x10] ss:$24 sps:$4 sm:$0xff]   ;;  %v1003_v58 = vld [vmem:[%s1234_s1 + $0x44] ss:$24 sps:$4 sm:$0xff]   ;;  %v1005_v59 = vld [vmem:[%s1234_s1 + $0x40] ss:$24 sps:$4 sm:$0xff]  }
  0x15   :  { %881 = vmatpush3.bf16.msra.mxu1 %v959_v19  ;;  %854 = vmatprep.subr.bf16.mxu0 %v960_v20  ;;  %v1006_v60 = vld [vmem:[%s1235_s2] sm:$0xff]  }
  0x16   :  { %882 = vmatprep.subr.bf16.mxu1 %v961_v21 }
  0x18   :  { %855 = vmatpush3.bf16.msra.mxu0 %v962_v22 }
  0x19   :  { %883 = vmatpush3.bf16.msra.mxu1 %v963_v23  ;;  %856 = vmatprep.subr.bf16.mxu0 %v964_v24 }
  0x1a   :  { %884 = vmatprep.subr.bf16.mxu1 %v965_v25 }
  0x1c   :  { %857 = vmatpush3.bf16.msra.mxu0 %v966_v26 }
  0x1d   :  { %885 = vmatpush3.bf16.msra.mxu1 %v967_v27  ;;  %858 = vmatprep.subr.bf16.mxu0 %v968_v28 }
  0x1e   :  { %886 = vmatprep.subr.bf16.mxu1 %v969_v29 }
  0x20   :  { %859 = vmatpush3.bf16.msra.mxu0 %v970_v30 }
  0x21   :  { %887 = vmatpush3.bf16.msra.mxu1 %v971_v31  ;;  %900 = vmatprep.subr.bf16.mxu0 %v978_v36 }
  0x23   :  { %506 = vmatmul.mubr.bf16.vlgmr.msra.gmra.mxu0 %v972_v32 }
  0x24   :  { %555 = vmatmul.mubr.bf16.vlgmr.msra.gmra.mxu1 %v975_v34  ;;  %901 = vmatpush3.bf16.msra.mxu0 %v979_v37 }
  0x25   :  { %902 = vmatprep.subr.bf16.mxu0 %v980_v38  ;;  %513 = vmatprep.mubr.bf16.mxu0 %v987_v44 }
  0x26   :  { %562 = vmatprep.mubr.bf16.mxu1 %v989_v45 }
  0x28   :  { %903 = vmatpush3.bf16.msra.mxu0 %v981_v39 }
  0x29   :  { %904 = vmatprep.subr.bf16.mxu0 %v982_v40 }
  0x2b   :  { %514 = vmatmul.mubr.bf16.gmra.mxu0 %v992_v47 }
  0x2c   :  { %905 = vmatpush3.bf16.msra.mxu0 %v983_v41  ;;  %563 = vmatmul.mubr.bf16.gmra.mxu1 %v993_v48 }
  0x2d   :  { %906 = vmatprep.subr.bf16.mxu0 %v984_v42  ;;  %603 = vmatprep.mubr.bf16.mxu0 %v1002_v52 }
  0x2e   :  { %936 = vmatprep.mubr.msk.bf16.mxu1 %vm654_vm0, %v1006_v60 }
  0x30   :  { %907 = vmatpush3.bf16.msra.mxu0 %v985_v43  ;;  %v1007_v43 = vld [vmem:[%s1235_s2 + $0x8] sm:$0xff]  }
  0x31   :  { %908 = vmatprep.subr.bf16.mxu0 %v986_v46 }
  0x34   :  { %909 = vmatpush3.bf16.msra.mxu0 %v991_v49 }
  0x35   :  { %910 = vmatprep.subr.bf16.mxu0 %v994_v50 }
  0x38   :  { %911 = vmatpush3.bf16.msra.mxu0 %v995_v51 }
  0x39   :  { %912 = vmatprep.subr.bf16.mxu0 %v996_v53 }
  0x3c   :  { %913 = vmatpush3.bf16.msra.mxu0 %v997_v54 }
  0x3d   :  { %914 = vmatprep.subr.bf16.mxu0 %v998_v55 }
  0x40   :  { %915 = vmatpush3.bf16.msra.mxu0 %v999_v56 }
  0x43   :  { %604 = vmatmul.mubr.bf16.vlgmr.msra.gmra.mxu0 %v1000_v57 }
  0x44   :  { %611 = vmatprep.mubr.bf16.mxu0 %v1003_v58 }
  0x4b   :  { %612 = vmatmul.mubr.bf16.gmra.mxu0 %v1005_v59 }
  0xe3   :  { %v860_v61 = vpop.f32.mrf.mxu0 }
  0xe4   :  { %v888_v0 = vpop.f32.mrf.mxu1 }
  0xe5   :  { %v861_v62 = vpop.f32.mrf.mxu0 }
  0xe6   :  { %v889_v2 = vpop.f32.mrf.mxu1  ;;  %v862_v13 = vadd.f32 %v861_v62, %v860_v61 }
  0xe7   :  { %v863_v63 = vpop.f32.mrf.mxu0  ;;  %v890_v14 = vadd.f32 %v889_v2, %v888_v0 }
  0xe8   :  { %v891_v4 = vpop.f32.mrf.mxu1 }
  0xe9   :  { %v864_v1 = vpop.f32.mrf.mxu0  ;;  %v557_v21 = vadd.f32 %v890_v14, %v862_v13 }
  0xea   :  { %v892_v6 = vpop.f32.mrf.mxu1  ;;  %v865_v15 = vadd.f32 %v864_v1, %v863_v63 }
  0xeb   :  { %v866_v3 = vpop.f32.mrf.mxu0  ;;  %v893_v16 = vadd.f32 %v892_v6, %v891_v4 }
  0xec   :  { %v894_v8 = vpop.f32.mrf.mxu1 }
  0xed   :  { %v867_v5 = vpop.f32.mrf.mxu0  ;;  %v560_v22 = vadd.f32 %v893_v16, %v865_v15 }
  0xee   :  { %v895_v10 = vpop.f32.mrf.mxu1  ;;  %v868_v28 = vadd.f32 %v867_v5, %v866_v3 }
  0xef   :  { %v869_v7 = vpop.f32.mrf.mxu0  ;;  %v896_v30 = vadd.f32 %v895_v10, %v894_v8 }
  0xf0   :  { %v897_v17 = vpop.f32.mrf.mxu1 }
  0xf1   :  { %v870_v9 = vpop.f32.mrf.mxu0  ;;  %v565_v37 = vadd.f32 %v896_v30, %v868_v28 }
  0xf2   :  { %v898_v24 = vpop.f32.mrf.mxu1  ;;  %v871_v31 = vadd.f32 %v870_v9, %v869_v7 }
  0xf3   :  { %v899_v32 = vadd.f32 %v898_v24, %v897_v17 }
  0xf5   :  { %v568_v38 = vadd.f32 %v899_v32, %v871_v31 }
 0x103   :  { %v916_v11 = vpop.f32.mrf.mxu0 }
 0x105   :  { %v917_v12 = vpop.f32.mrf.mxu0 }
 0x106   :  { %v918_v19 = vadd.f32 %v917_v12, %v916_v11 }
 0x107   :  { %v919_v18 = vpop.f32.mrf.mxu0 }
 0x108   :  { %v606_v26 = vadd.f32 %v918_v19, %v557_v21 }
 0x109   :  { %v920_v20 = vpop.f32.mrf.mxu0 }
 0x10a   :  { %v921_v23 = vadd.f32 %v920_v20, %v919_v18 }
 0x10b   :  { %v922_v25 = vpop.f32.mrf.mxu0 }
 0x10c   :  { %v609_v27 = vadd.f32 %v921_v23, %v560_v22 }
 0x10d   :  { %v923_v29 = vpop.f32.mrf.mxu0 }
 0x10e   :  { %v620_v33 = vpack.c.bf16 %v609_v27, %v606_v26  ;;  %v924_v35 = vadd.f32 %v923_v29, %v922_v25 }
 0x10f   :  { %v925_v34 = vpop.f32.mrf.mxu0 }
 0x110   :  { %826 = vst [vmem:[%s1236_s3] sm:$0xff] %v620_v33   ;;  %v614_v40 = vadd.f32 %v924_v35, %v565_v37 }
 0x111   :  { %v926_v36 = vpop.f32.mrf.mxu0 }
 0x112   :  { %v927_v39 = vadd.f32 %v926_v36, %v925_v34 }
 0x114   :  { %v617_v41 = vadd.f32 %v927_v39, %v568_v38 }
 0x116   :  { %v621_v42 = vpack.c.bf16 %v617_v41, %v614_v40 }
 0x118   :  { %842 = vst [vmem:[%s1236_s3 + $0x8] sm:$0xff] %v621_v42   ;;  %932 = vmatprep.subr.bf16.mxu1 %v621_v42 }
 0x119   :  { %933 = vmatpush3.bf16.msra.mxu1 %v621_v42 }
 0x11a   :  { %934 = vmatprep.subr.bf16.mxu1 %v620_v33 }
 0x11d   :  { %935 = vmatpush3.bf16.msra.mxu1 %v620_v33 }
 0x120   :  { %937 = vmatmul.mubr.msk.bf16.vlgmr.msra.gmra.mxu1 %vm654_vm0, %v1007_v43 }
 0x1e0   :  { %v938_v44 = vpop.f32.mrf.mxu1 }
 0x1e1   :  { %v712_v47 = vmax.f32 %v938_v44, 0.0 }
 0x1e2   :  { %v695_v45 = vpop.f32.mrf.mxu1 }
 0x1e3   :  { %v710_v50 = vmax.f32 %v695_v45, 0.0 }
 0x1e4   :  { %v939_v46 = vpop.f32.mrf.mxu1 }
 0x1e5   :  { %v713_v48 = vmax.f32 %v939_v46, 0.0 }
 0x1e6   :  { %v698_v49 = vpop.f32.mrf.mxu1 }
 0x1e7   :  { %v840_v51 = vpack.c.bf16 %v713_v48, %v712_v47  ;;  %v711_v52 = vmax.f32 %v698_v49, 0.0 }
 0x1e9   :  { %843 = vst [vmem:[%s1237_s4 + $0x8] sm:$0xff] %v840_v51   ;;  %v835_v53 = vpack.c.bf16 %v711_v52, %v710_v50 }
 0x1eb   :  { %836 = vst [vmem:[%s1237_s4] sm:$0xff] %v835_v53  }

// kernel: clf_img_forward.9
= control target key start
LH: loop header
LB: loop body
LE: loop exit
PB: predicated region body
PF: predicated region fallthrough
CT: control target
= control target key end

     0   :  { %vm1404_vm0 = vmmov 0   ;;  %vm943_vm1 = vcmask 1043456   ;;  %vm933_vm2 = vcmask 326656   ;;  %vm1033_vm3 = vcmask 15360   ;;  %s1734_s0 = inlined_call_operand.vmem [shape: bf16[1024,2], index: 0, kind: input, shape index: {}]   ;;  %s1735_s1 = inlined_call_operand.vmem [shape: bf16[40,1024], index: 1, kind: input, shape index: {}]   ;;  %s1736_s2 = inlined_call_operand.vmem [shape: bf16[40,40], index: 2, kind: input, shape index: {}]   ;;  %s1737_s3 = inlined_call_operand.vmem [shape: f32[40,1], index: 3, kind: input, shape index: {}]   ;;  %s1738_s4 = inlined_call_operand.vmem [shape: f32[40,2], index: 4, kind: output, shape index: {}]  }
   0x1   :  { %v1308_v0 = vld [vmem:[%s1734_s0 + $0x78] sm:$0xff]   ;;  %v1312_v4 = vld [vmem:[%s1734_s0 + $0x70] sm:$0xff]   ;;  %v1316_v8 = vld [vmem:[%s1734_s0 + $0x68] sm:$0xff]  }
   0x2   :  { %v1309_v1 = vld [vmem:[%s1734_s0 + $0xf8] sm:$0xff]   ;;  %1137 = vmatprep.subr.bf16.mxu0 %v1308_v0  ;;  %v1313_v5 = vld [vmem:[%s1734_s0 + $0xf0] sm:$0xff]   ;;  %v1317_v9 = vld [vmem:[%s1734_s0 + $0xe8] sm:$0xff]  }
   0x3   :  { %v1310_v2 = vld [vmem:[%s1734_s0 + $0x38] sm:$0xff]   ;;  %1171 = vmatprep.subr.bf16.mxu1 %v1309_v1  ;;  %v1314_v6 = vld [vmem:[%s1734_s0 + $0x30] sm:$0xff]   ;;  %v1318_v10 = vld [vmem:[%s1734_s0 + $0x28] sm:$0xff]  }
   0x4   :  { %v1311_v3 = vld [vmem:[%s1734_s0 + $0xb8] sm:$0xff]   ;;  %1138 = vmatpush3.bf16.msra.mxu0 %v1310_v2  ;;  %v1315_v7 = vld [vmem:[%s1734_s0 + $0xb0] sm:$0xff]   ;;  %v1319_v11 = vld [vmem:[%s1734_s0 + $0xa8] sm:$0xff]  }
   0x5   :  { %1172 = vmatpush3.bf16.msra.mxu1 %v1311_v3  ;;  %1139 = vmatprep.subr.bf16.mxu0 %v1312_v4  ;;  %v1320_v12 = vld [vmem:[%s1734_s0 + $0x60] sm:$0xff]   ;;  %v1324_v16 = vld [vmem:[%s1734_s0 + $0x58] sm:$0xff]   ;;  %v1328_v20 = vld [vmem:[%s1734_s0 + $0x50] sm:$0xff]  }
   0x6   :  { %1173 = vmatprep.subr.bf16.mxu1 %v1313_v5  ;;  %v1321_v13 = vld [vmem:[%s1734_s0 + $0xe0] sm:$0xff]   ;;  %v1325_v17 = vld [vmem:[%s1734_s0 + $0xd8] sm:$0xff]   ;;  %v1329_v21 = vld [vmem:[%s1734_s0 + $0xd0] sm:$0xff]  }
   0x7   :  { %v1322_v14 = vld [vmem:[%s1734_s0 + $0x20] sm:$0xff]   ;;  %v1326_v18 = vld [vmem:[%s1734_s0 + $0x18] sm:$0xff]   ;;  %v1330_v22 = vld [vmem:[%s1734_s0 + $0x10] sm:$0xff]  }
   0x8   :  { %1140 = vmatpush3.bf16.msra.mxu0 %v1314_v6  ;;  %v1323_v15 = vld [vmem:[%s1734_s0 + $0xa0] sm:$0xff]   ;;  %v1327_v19 = vld [vmem:[%s1734_s0 + $0x98] sm:$0xff]   ;;  %v1331_v23 = vld [vmem:[%s1734_s0 + $0x90] sm:$0xff]  }
   0x9   :  { %1174 = vmatpush3.bf16.msra.mxu1 %v1315_v7  ;;  %1141 = vmatprep.subr.bf16.mxu0 %v1316_v8  ;;  %v1332_v24 = vld [vmem:[%s1734_s0 + $0x48] sm:$0xff]   ;;  %v1336_v28 = vld [vmem:[%s1734_s0 + $0x40] sm:$0xff]   ;;  %v1340_v40 = vld [vmem:[%s1734_s0 + $0x178] sm:$0xff]  }
   0xa   :  { %1175 = vmatprep.subr.bf16.mxu1 %v1317_v9  ;;  %v1333_v25 = vld [vmem:[%s1734_s0 + $0xc8] sm:$0xff]   ;;  %v1337_v29 = vld [vmem:[%s1734_s0 + $0xc0] sm:$0xff]   ;;  %v1341_v41 = vld [vmem:[%s1734_s0 + $0x1f8] sm:$0xff]  }
   0xb   :  { %v1334_v26 = vld [vmem:[%s1734_s0 + $0x8] sm:$0xff]   ;;  %v1338_v30 = vld [vmem:[%s1734_s0] sm:$0xff]   ;;  %v1342_v42 = vld [vmem:[%s1734_s0 + $0x138] sm:$0xff]  }
   0xc   :  { %1142 = vmatpush3.bf16.msra.mxu0 %v1318_v10  ;;  %v1335_v27 = vld [vmem:[%s1734_s0 + $0x88] sm:$0xff]   ;;  %v1339_v31 = vld [vmem:[%s1734_s0 + $0x80] sm:$0xff]   ;;  %v1343_v43 = vld [vmem:[%s1734_s0 + $0x1b8] sm:$0xff]  }
   0xd   :  { %1176 = vmatpush3.bf16.msra.mxu1 %v1319_v11  ;;  %1143 = vmatprep.subr.bf16.mxu0 %v1320_v12  ;;  %v18_v32 = vld [vmem:[%s1735_s1] sm:$0xff]  ;;  %v19_v34 = vld [vmem:[%s1735_s1 + $0x8] sm:$0xff]  ;;  %v1344_v44 = vld [vmem:[%s1734_s0 + $0x170] sm:$0xff]  }
   0xe   :  { %1177 = vmatprep.subr.bf16.mxu1 %v1321_v13  ;;  %v22_v33 = vld [vmem:[%s1735_s1 + $0x20] sm:$0xff]  ;;  %v23_v37 = vld [vmem:[%s1735_s1 + $0x28] sm:$0xff]  ;;  %v1345_v45 = vld [vmem:[%s1734_s0 + $0x1f0] sm:$0xff]  }
   0xf   :  { %v1043_v35 = vcombine.low %v18_v32, %v22_v33  ;;  %v1044_v36 = vcombine.high %v18_v32, %v22_v33  ;;  %v1045_v38 = vcombine.low %v19_v34, %v23_v37  ;;  %v1046_v39 = vcombine.high %v19_v34, %v23_v37  ;;  %v1346_v46 = vld [vmem:[%s1734_s0 + $0x130] sm:$0xff]   ;;  %v1348_v48 = vld [vmem:[%s1734_s0 + $0x168] sm:$0xff]   ;;  %v26_v50 = vld [vmem:[%s1735_s1 + $0x40] sm:$0xff] }
  0x10   :  { %1144 = vmatpush3.bf16.msra.mxu0 %v1322_v14  ;;  %v1347_v47 = vld [vmem:[%s1734_s0 + $0x1b0] sm:$0xff]   ;;  %v1349_v49 = vld [vmem:[%s1734_s0 + $0x1e8] sm:$0xff]   ;;  %v30_v51 = vld [vmem:[%s1735_s1 + $0x60] sm:$0xff] }
  0x11   :  { %1178 = vmatpush3.bf16.msra.mxu1 %v1323_v15  ;;  %1145 = vmatprep.subr.bf16.mxu0 %v1324_v16  ;;  %v1052_v52 = vcombine.high %v26_v50, %v30_v51  ;;  %v27_v53 = vld [vmem:[%s1735_s1 + $0x48] sm:$0xff]  ;;  %v1051_v55 = vcombine.low %v26_v50, %v30_v51  ;;  %v1352_v60 = vld [vmem:[%s1734_s0 + $0x160] sm:$0xff]   ;;  %v1356_v0 = vld [vmem:[%s1734_s0 + $0x158] sm:$0xff]  }
  0x12   :  { %1179 = vmatprep.subr.bf16.mxu1 %v1325_v17  ;;  %690 = vmatprep.mubr.bf16.mxu0 %v1044_v36  ;;  %v31_v54 = vld [vmem:[%s1735_s1 + $0x68] sm:$0xff]  ;;  %v1353_v61 = vld [vmem:[%s1734_s0 + $0x1e0] sm:$0xff]   ;;  %v1357_v1 = vld [vmem:[%s1734_s0 + $0x1d8] sm:$0xff]  }
  0x13   :  { %746 = vmatprep.mubr.bf16.mxu1 %v1046_v39  ;;  %v1054_v56 = vcombine.high %v27_v53, %v31_v54  ;;  %v1350_v57 = vld [vmem:[%s1734_s0 + $0x128] sm:$0xff]   ;;  %v1053_v58 = vcombine.low %v27_v53, %v31_v54  ;;  %v1354_v62 = vld [vmem:[%s1734_s0 + $0x120] sm:$0xff]   ;;  %v1359_v4 = vld [vmem:[%s1734_s0 + $0x118] sm:$0xff]  }
  0x14   :  { %1146 = vmatpush3.bf16.msra.mxu0 %v1326_v18  ;;  %v1351_v59 = vld [vmem:[%s1734_s0 + $0x1a8] sm:$0xff]   ;;  %v1355_v63 = vld [vmem:[%s1734_s0 + $0x1a0] sm:$0xff]   ;;  %v1360_v6 = vld [vmem:[%s1734_s0 + $0x198] sm:$0xff]  }
  0x15   :  { %1180 = vmatpush3.bf16.msra.mxu1 %v1327_v19  ;;  %1147 = vmatprep.subr.bf16.mxu0 %v1328_v20  ;;  %v34_v2 = vld [vmem:[%s1735_s1 + $0x80] sm:$0xff]  ;;  %v35_v7 = vld [vmem:[%s1735_s1 + $0x88] sm:$0xff]  ;;  %v1364_v10 = vld [vmem:[%s1734_s0 + $0x150] sm:$0xff]  }
  0x16   :  { %1181 = vmatprep.subr.bf16.mxu1 %v1329_v21  ;;  %v1060_v3 = vcombine.high %v34_v2, %v34_v2  ;;  %v1059_v5 = vcombine.low %v34_v2, %v34_v2  ;;  %v1062_v8 = vcombine.high %v35_v7, %v35_v7  ;;  %v1061_v9 = vcombine.low %v35_v7, %v35_v7  ;;  %v1365_v11 = vld [vmem:[%s1734_s0 + $0x1d0] sm:$0xff]   ;;  %v1368_v14 = vld [vmem:[%s1734_s0 + $0x148] sm:$0xff]   ;;  %v1372_v18 = vld [vmem:[%s1734_s0 + $0x140] sm:$0xff]  }
  0x17   :  { %v1366_v12 = vld [vmem:[%s1734_s0 + $0x110] sm:$0xff]   ;;  %v1369_v15 = vld [vmem:[%s1734_s0 + $0x1c8] sm:$0xff]   ;;  %v1373_v19 = vld [vmem:[%s1734_s0 + $0x1c0] sm:$0xff]  }
  0x18   :  { %1148 = vmatpush3.bf16.msra.mxu0 %v1330_v22  ;;  %v1367_v13 = vld [vmem:[%s1734_s0 + $0x190] sm:$0xff]   ;;  %v1370_v16 = vld [vmem:[%s1734_s0 + $0x108] sm:$0xff]   ;;  %v1374_v20 = vld [vmem:[%s1734_s0 + $0x100] sm:$0xff]  }
  0x19   :  { %1182 = vmatpush3.bf16.msra.mxu1 %v1331_v23  ;;  %1149 = vmatprep.subr.bf16.mxu0 %v1332_v24  ;;  %v1371_v17 = vld [vmem:[%s1734_s0 + $0x188] sm:$0xff]   ;;  %v1375_v21 = vld [vmem:[%s1734_s0 + $0x180] sm:$0xff]   ;;  %v20_v22 = vld [vmem:[%s1735_s1 + $0x10] sm:$0xff] }
  0x1a   :  { %1183 = vmatprep.subr.bf16.mxu1 %v1333_v25  ;;  %v24_v23 = vld [vmem:[%s1735_s1 + $0x30] sm:$0xff]  ;;  %v29_v32 = vld [vmem:[%s1735_s1 + $0x58] sm:$0xff]  ;;  %v894_v50 = vld [vmem:[%s1737_s3 + $0x20] sm:$0xff] }
  0x1b   :  { %v1047_v24 = vcombine.low %v20_v22, %v24_v23  ;;  %v1048_v25 = vcombine.high %v20_v22, %v24_v23  ;;  %v33_v33 = vld [vmem:[%s1735_s1 + $0x78] sm:$0xff]  ;;  %v36_v36 = vld [vmem:[%s1735_s1 + $0x90] sm:$0xff] }
  0x1c   :  { %1150 = vmatpush3.bf16.msra.mxu0 %v1334_v26  ;;  %v21_v26 = vld [vmem:[%s1735_s1 + $0x18] sm:$0xff]  ;;  %v1057_v39 = vcombine.low %v29_v32, %v33_v33 }
  0x1d   :  { %1184 = vmatpush3.bf16.msra.mxu1 %v1335_v27  ;;  %1151 = vmatprep.subr.bf16.mxu0 %v1336_v28  ;;  %v25_v27 = vld [vmem:[%s1735_s1 + $0x38] sm:$0xff]  ;;  %v28_v28 = vld [vmem:[%s1735_s1 + $0x50] sm:$0xff] }
  0x1e   :  { %1185 = vmatprep.subr.bf16.mxu1 %v1337_v29  ;;  %v1049_v29 = vcombine.low %v21_v26, %v25_v27  ;;  %v37_v37 = vld [vmem:[%s1735_s1 + $0x98] sm:$0xff] }
  0x20   :  { %1152 = vmatpush3.bf16.msra.mxu0 %v1338_v30  ;;  %v1050_v30 = vcombine.high %v21_v26, %v25_v27 }
  0x21   :  { %1186 = vmatpush3.bf16.msra.mxu1 %v1339_v31  ;;  %1205 = vmatprep.subr.bf16.mxu0 %v1340_v40  ;;  %v32_v31 = vld [vmem:[%s1735_s1 + $0x70] sm:$0xff]  ;;  %v1064_v40 = vcombine.high %v36_v36, %v36_v36 }
  0x22   :  { %1239 = vmatprep.subr.bf16.mxu1 %v1341_v41  ;;  %v1056_v34 = vcombine.high %v28_v28, %v32_v31  ;;  %v1066_v41 = vcombine.high %v37_v37, %v37_v37 }
  0x23   :  { %691 = vmatmul.mubr.bf16.vlgmr.msra.gmra.mxu0 %v1043_v35  ;;  %v1058_v35 = vcombine.high %v29_v32, %v33_v33 }
  0x24   :  { %747 = vmatmul.mubr.bf16.vlgmr.msra.gmra.mxu1 %v1045_v38  ;;  %1206 = vmatpush3.bf16.msra.mxu0 %v1342_v42  ;;  %v1055_v38 = vcombine.low %v28_v28, %v32_v31  ;;  %v1063_v42 = vcombine.low %v36_v36, %v36_v36 }
  0x25   :  { %1240 = vmatpush3.bf16.msra.mxu1 %v1343_v43  ;;  %1207 = vmatprep.subr.bf16.mxu0 %v1344_v44  ;;  %v1065_v43 = vcombine.low %v37_v37, %v37_v37  ;;  %v1403_v44 = vmov 0.0  }
  0x26   :  { %1241 = vmatprep.subr.bf16.mxu1 %v1345_v45  ;;  %698 = vmatprep.mubr.bf16.mxu0 %v1052_v52  ;;  %v1405_v45 = vmov 0  }
  0x27   :  { %754 = vmatprep.mubr.bf16.mxu1 %v1054_v56  ;;  %1306 = vset.pattern.permute.xlu0 %v1405_v45 }
  0x28   :  { %1208 = vmatpush3.bf16.msra.mxu0 %v1346_v46  ;;  %v890_v46 = vld [vmem:[%s1737_s3] sm:$0xff]  ;;  %1307 = vset.pattern.permute.xlu1 %v1405_v45 }
  0x29   :  { %1242 = vmatpush3.bf16.msra.mxu1 %v1347_v47  ;;  %1209 = vmatprep.subr.bf16.mxu0 %v1348_v48  ;;  %v892_v47 = vld [vmem:[%s1737_s3 + $0x10] sm:$0xff]  ;;  %v891_v48 = vld [vmem:[%s1737_s3 + $0x8] sm:$0xff] }
  0x2a   :  { %1243 = vmatprep.subr.bf16.mxu1 %v1349_v49  ;;  %897 = vperm.xlu0 %1306, %v890_v46   ;;  %v893_v49 = vld [vmem:[%s1737_s3 + $0x18] sm:$0xff] }
  0x2b   :  { %699 = vmatmul.mubr.bf16.gmra.mxu0 %v1051_v55  ;;  %907 = vperm.xlu1 %1307, %v892_v47  }
  0x2c   :  { %1210 = vmatpush3.bf16.msra.mxu0 %v1350_v57  ;;  %755 = vmatmul.mubr.bf16.gmra.mxu1 %v1053_v58 }
  0x2d   :  { %1244 = vmatpush3.bf16.msra.mxu1 %v1351_v59  ;;  %1211 = vmatprep.subr.bf16.mxu0 %v1352_v60 }
  0x2e   :  { %1245 = vmatprep.subr.bf16.mxu1 %v1353_v61  ;;  %706 = vmatprep.mubr.bf16.mxu0 %v1060_v3 }
  0x2f   :  { %762 = vmatprep.mubr.bf16.mxu1 %v1062_v8  ;;  %902 = vperm.xlu0 %1306, %v891_v48  }
  0x30   :  { %1212 = vmatpush3.bf16.msra.mxu0 %v1354_v62  ;;  %912 = vperm.xlu1 %1307, %v893_v49  }
  0x31   :  { %1246 = vmatpush3.bf16.msra.mxu1 %v1355_v63  ;;  %1213 = vmatprep.subr.bf16.mxu0 %v1356_v0 }
  0x32   :  { %1247 = vmatprep.subr.bf16.mxu1 %v1357_v1 }
  0x33   :  { %707 = vmatmul.mubr.bf16.gmra.mxu0 %v1059_v5  ;;  %917 = vperm.xlu0 %1306, %v894_v50  }
  0x34   :  { %1214 = vmatpush3.bf16.msra.mxu0 %v1359_v4  ;;  %763 = vmatmul.mubr.bf16.gmra.mxu1 %v1061_v9 }
  0x35   :  { %1248 = vmatpush3.bf16.msra.mxu1 %v1360_v6  ;;  %1215 = vmatprep.subr.bf16.mxu0 %v1364_v10 }
  0x36   :  { %1249 = vmatprep.subr.bf16.mxu1 %v1365_v11  ;;  %802 = vmatprep.mubr.bf16.mxu0 %v1048_v25 }
  0x37   :  { %858 = vmatprep.mubr.bf16.mxu1 %v1050_v30 }
  0x38   :  { %1216 = vmatpush3.bf16.msra.mxu0 %v1366_v12 }
  0x39   :  { %1250 = vmatpush3.bf16.msra.mxu1 %v1367_v13  ;;  %1217 = vmatprep.subr.bf16.mxu0 %v1368_v14 }
  0x3a   :  { %1251 = vmatprep.subr.bf16.mxu1 %v1369_v15 }
  0x3c   :  { %1218 = vmatpush3.bf16.msra.mxu0 %v1370_v16 }
  0x3d   :  { %1252 = vmatpush3.bf16.msra.mxu1 %v1371_v17  ;;  %1219 = vmatprep.subr.bf16.mxu0 %v1372_v18 }
  0x3e   :  { %1253 = vmatprep.subr.bf16.mxu1 %v1373_v19 }
  0x40   :  { %1220 = vmatpush3.bf16.msra.mxu0 %v1374_v20 }
  0x41   :  { %1254 = vmatpush3.bf16.msra.mxu1 %v1375_v21  ;;  %1279 = vmatprep.subr.bf16.mxu0 %v1403_v44 }
  0x42   :  { %1297 = vmatprep.subr.bf16.mxu1 %v1403_v44 }
  0x43   :  { %803 = vmatmul.mubr.bf16.vlgmr.msra.gmra.mxu0 %v1047_v24 }
  0x44   :  { %859 = vmatmul.mubr.bf16.vlgmr.msra.gmra.mxu1 %v1049_v29  ;;  %810 = vmatprep.mubr.bf16.mxu0 %v1056_v34 }
  0x45   :  { %866 = vmatprep.mubr.bf16.mxu1 %v1058_v35 }
  0x4b   :  { %811 = vmatmul.mubr.bf16.gmra.mxu0 %v1055_v38 }
  0x4c   :  { %867 = vmatmul.mubr.bf16.gmra.mxu1 %v1057_v39  ;;  %818 = vmatprep.mubr.bf16.mxu0 %v1064_v40 }
  0x4d   :  { %874 = vmatprep.mubr.bf16.mxu1 %v1066_v41 }
  0x53   :  { %819 = vmatmul.mubr.bf16.gmra.mxu0 %v1063_v42 }
  0x54   :  { %875 = vmatmul.mubr.bf16.gmra.mxu1 %v1065_v43  ;;  %1285 = vmatprep.mubr.msk.bf16.mxu0 %vm1404_vm0, %v1403_v44 }
  0x55   :  { %1289 = vmatprep.mubr.msk.bf16.mxu1 %vm1404_vm0, %v1403_v44 }
  0xe3   :  { %v1153_v51 = vpop.f32.mrf.mxu0 }
  0xe4   :  { %v1187_v52 = vpop.f32.mrf.mxu1 }
  0xe5   :  { %v1154_v53 = vpop.f32.mrf.mxu0 }
  0xe6   :  { %v1188_v54 = vpop.f32.mrf.mxu1  ;;  %v1155_v46 = vadd.f32 %v1154_v53, %v1153_v51 }
  0xe7   :  { %v1156_v55 = vpop.f32.mrf.mxu0  ;;  %v1189_v50 = vadd.f32 %v1188_v54, %v1187_v52 }
  0xe8   :  { %v1190_v56 = vpop.f32.mrf.mxu1 }
  0xe9   :  { %v1157_v57 = vpop.f32.mrf.mxu0 }
  0xea   :  { %v1191_v58 = vpop.f32.mrf.mxu1  ;;  %v1158_v40 = vadd.f32 %v1157_v57, %v1156_v55  ;;  %v749_v57 = vadd.f32 %v1189_v50, %v1155_v46 }
  0xeb   :  { %v1159_v59 = vpop.f32.mrf.mxu0  ;;  %v1192_v41 = vadd.f32 %v1191_v58, %v1190_v56 }
  0xec   :  { %v1193_v60 = vpop.f32.mrf.mxu1 }
  0xed   :  { %v1160_v61 = vpop.f32.mrf.mxu0 }
  0xee   :  { %v1194_v62 = vpop.f32.mrf.mxu1  ;;  %v1161_v33 = vadd.f32 %v1160_v61, %v1159_v59 }
  0xef   :  { %v1162_v63 = vpop.f32.mrf.mxu0  ;;  %v1195_v34 = vadd.f32 %v1194_v62, %v1193_v60  ;;  %v752_v62 = vadd.f32 %v1192_v41, %v1158_v40 }
  0xf0   :  { %v1196_v0 = vpop.f32.mrf.mxu1 }
  0xf1   :  { %v1163_v1 = vpop.f32.mrf.mxu0 }
  0xf2   :  { %v1197_v3 = vpop.f32.mrf.mxu1  ;;  %v1164_v29 = vadd.f32 %v1163_v1, %v1162_v63  ;;  %v757_v63 = vadd.f32 %v1195_v34, %v1161_v33 }
  0xf3   :  { %v1165_v2 = vpop.f32.mrf.mxu0  ;;  %v1198_v30 = vadd.f32 %v1197_v3, %v1196_v0 }
  0xf4   :  { %v1199_v5 = vpop.f32.mrf.mxu1 }
  0xf5   :  { %v1166_v4 = vpop.f32.mrf.mxu0  ;;  %v760_v42 = vadd.f32 %v1198_v30, %v1164_v29 }
  0xf6   :  { %v1200_v7 = vpop.f32.mrf.mxu1  ;;  %v1167_v26 = vadd.f32 %v1166_v4, %v1165_v2 }
  0xf7   :  { %v1168_v6 = vpop.f32.mrf.mxu0  ;;  %v1201_v27 = vadd.f32 %v1200_v7, %v1199_v5 }
  0xf8   :  { %v1202_v9 = vpop.f32.mrf.mxu1 }
  0xf9   :  { %v1169_v8 = vpop.f32.mrf.mxu0  ;;  %v765_v37 = vadd.f32 %v1201_v27, %v1167_v26 }
  0xfa   :  { %v1203_v10 = vpop.f32.mrf.mxu1 }
 0x103   :  { %v1221_v11 = vpop.f32.mrf.mxu0 }
 0x104   :  { %v1255_v12 = vpop.f32.mrf.mxu1 }
 0x105   :  { %v1222_v13 = vpop.f32.mrf.mxu0 }
 0x106   :  { %v1256_v14 = vpop.f32.mrf.mxu1  ;;  %v1223_v2 = vadd.f32 %v1222_v13, %v1221_v11  ;;  %v1380_v11 = vld [vmem:[%s1736_s2 + $0x8] sm:$0xff]   ;;  %v1381_v13 = vld [vmem:[%s1736_s2] sm:$0xff]  }
 0x107   :  { %v1224_v15 = vpop.f32.mrf.mxu0  ;;  %v1257_v54 = vadd.f32 %v1256_v14, %v1255_v12  ;;  %v1382_v12 = vld [vmem:[%s1736_s2 + $0x10] ss:$0 sps:$4 sm:$0xff]   ;;  %v898_v14 = vpop.permute.xlu0 %897 }
 0x108   :  { %v1258_v16 = vpop.f32.mrf.mxu1  ;;  %v805_v5 = vadd.f32 %v1223_v2, %v749_v57 }
 0x109   :  { %v1225_v17 = vpop.f32.mrf.mxu0 }
 0x10a   :  { %v1259_v18 = vpop.f32.mrf.mxu1  ;;  %v1226_v0 = vadd.f32 %v1225_v17, %v1224_v15  ;;  %v861_v9 = vadd.f32 %v1257_v54, %v805_v5  ;;  %v908_v15 = vpop.permute.xlu1 %907 }
 0x10b   :  { %v1227_v19 = vpop.f32.mrf.mxu0  ;;  %v1260_v6 = vadd.f32 %v1259_v18, %v1258_v16 }
 0x10c   :  { %v1261_v20 = vpop.f32.mrf.mxu1  ;;  %v808_v58 = vadd.f32 %v1226_v0, %v752_v62 }
 0x10d   :  { %v1228_v21 = vpop.f32.mrf.mxu0 }
 0x10e   :  { %v1262_v22 = vpop.f32.mrf.mxu1  ;;  %v1229_v43 = vadd.f32 %v1228_v21, %v1227_v19  ;;  %v864_v7 = vadd.f32 %v1260_v6, %v808_v58  ;;  %v903_v19 = vpop.permute.xlu0 %902 }
 0x10f   :  { %v1230_v23 = vpop.f32.mrf.mxu0  ;;  %v1263_v4 = vadd.f32 %v1262_v22, %v1261_v20  ;;  %v913_v21 = vpop.permute.xlu1 %912 }
 0x110   :  { %v1264_v24 = vpop.f32.mrf.mxu1  ;;  %v813_v3 = vadd.f32 %v1229_v43, %v757_v63  ;;  %v887_v10 = vpack.c.bf16 %v864_v7, %v861_v9 }
 0x111   :  { %v1231_v25 = vpop.f32.mrf.mxu0 }
 0x112   :  { %v1265_v28 = vpop.f32.mrf.mxu1  ;;  %v1232_v35 = vadd.f32 %v1231_v25, %v1230_v23  ;;  %v869_v52 = vadd.f32 %v1263_v4, %v813_v3 }
 0x113   :  { %v1233_v31 = vpop.f32.mrf.mxu0  ;;  %v1266_v55 = vadd.f32 %v1265_v28, %v1264_v24 }
 0x114   :  { %v1267_v32 = vpop.f32.mrf.mxu1  ;;  %v816_v1 = vadd.f32 %v1232_v35, %v760_v42  ;;  %v918_v35 = vpop.permute.xlu0 %917 }
 0x115   :  { %v1234_v36 = vpop.f32.mrf.mxu0 }
 0x116   :  { %v1235_v38 = vadd.f32 %v1234_v36, %v1233_v31  ;;  %v1268_v39 = vpop.f32.mrf.mxu1  ;;  %v872_v51 = vadd.f32 %v1266_v55, %v816_v1 }
 0x117   :  { %v1236_v45 = vpop.f32.mrf.mxu0  ;;  %v1269_v48 = vadd.f32 %v1268_v39, %v1267_v32 }
 0x118   :  { %v821_v47 = vadd.f32 %v1235_v38, %v765_v37  ;;  %v1270_v49 = vpop.f32.mrf.mxu1  ;;  %v888_v8 = vpack.c.bf16 %v872_v51, %v869_v52 }
 0x119   :  { %v1237_v59 = vpop.f32.mrf.mxu0 }
 0x11a   :  { %v877_v60 = vadd.f32 %v1269_v48, %v821_v47  ;;  %v1271_v61 = vpop.f32.mrf.mxu1 }
 0x11c   :  { %v889_v56 = vpack.c.bf16 %v877_v60, %v877_v60 }
 0x11e   :  { %v945_v53 = vsel %vm943_vm1, %v889_v56, 0 }
 0x11f   :  { %1280 = vmatpush3.bf16.msra.mxu0 %v945_v53  ;;  %1300 = vmatpush3.bf16.msra.mxu1 %v945_v53 }
 0x120   :  { %1281 = vmatprep.subr.bf16.mxu0 %v1403_v44  ;;  %1298 = vmatprep.subr.bf16.mxu1 %v1403_v44 }
 0x123   :  { %1282 = vmatpush3.bf16.msra.mxu0 %v888_v8  ;;  %1301 = vmatpush3.bf16.msra.mxu1 %v888_v8 }
 0x124   :  { %1283 = vmatprep.subr.bf16.mxu0 %v1403_v44  ;;  %1299 = vmatprep.subr.bf16.mxu1 %v1403_v44 }
 0x127   :  { %1284 = vmatpush3.bf16.msra.mxu0 %v887_v10  ;;  %1302 = vmatpush3.bf16.msra.mxu1 %v887_v10 }
 0x12a   :  { %1290 = vmatmul.mubr.msk.bf16.vlgmr.msra.gmra.mxu1 %vm933_vm2, %v1380_v11  ;;  %1286 = vmatmul.mubr.msk.bf16.vlgmr.msra.gmra.mxu0 %vm933_vm2, %v1381_v13 }
 0x12b   :  { %1293 = vmatprep.mubr.msk.bf16.mxu1 %vm1404_vm0, %v1403_v44 }
 0x132   :  { %1294 = vmatmul.mubr.msk.bf16.gmra.mxu1 %vm933_vm2, %v1382_v12 }
 0x1ea   :  { %v989_v16 = vpop.f32.mrf.mxu1  ;;  %v981_v17 = vpop.f32.mrf.mxu0 }
 0x1eb   :  { %v990_v18 = vadd.f32 %v989_v16, %v908_v15  ;;  %v982_v20 = vadd.f32 %v981_v17, %v898_v14 }
 0x1ec   :  { %v1291_v22 = vpop.f32.mrf.mxu1  ;;  %v1287_v23 = vpop.f32.mrf.mxu0 }
 0x1ed   :  { %v1005_v24 = vsub.f32 0.0, %v990_v18  ;;  %v1003_v25 = vsub.f32 0.0, %v982_v20 }
 0x1ee   :  { %v992_v26 = vpop.f32.mrf.mxu1  ;;  %v984_v27 = vpop.f32.mrf.mxu0 }
 0x1ef   :  { %v1012_v44 = vmul.f32 1.442695, %v1005_v24  ;;  %v1008_v28 = vmul.f32 1.442695, %v1003_v25  ;;  %v993_v29 = vadd.f32 %v992_v26, %v913_v21  ;;  %v985_v30 = vadd.f32 %v984_v27, %v903_v19 }
 0x1f0   :  { %v1292_v31 = vpop.f32.mrf.mxu1  ;;  %v1288_v32 = vpop.f32.mrf.mxu0 }
 0x1f1   :  { %1383 = vpow2.f32 %v1012_v44  ;;  %v1006_v33 = vsub.f32 0.0, %v993_v29  ;;  %v1004_v34 = vsub.f32 0.0, %v985_v30 }
 0x1f2   :  { %1385 = vpow2.f32 %v1008_v28  ;;  %v997_v36 = vpop.f32.mrf.mxu1 }
 0x1f3   :  { %v1014_v37 = vmul.f32 1.442695, %v1006_v33  ;;  %v1010_v38 = vmul.f32 1.442695, %v1004_v34  ;;  %v998_v39 = vadd.f32 %v997_v36, %v918_v35 }
 0x1f4   :  { %v1295_v40 = vpop.f32.mrf.mxu1 }
 0x1f5   :  { %1387 = vpow2.f32 %v1014_v37  ;;  %v1007_v41 = vsub.f32 0.0, %v998_v39 }
 0x1f6   :  { %1389 = vpow2.f32 %v1010_v38  ;;  %v1000_v42 = vpop.f32.mrf.mxu1 }
 0x1f7   :  { %v1016_v43 = vmul.f32 1.442695, %v1007_v41 }
 0x1f8   :  { %v1296_v45 = vpop.f32.mrf.mxu1 }
 0x1f9   :  { %1391 = vpow2.f32 %v1016_v43 }
 0x1fe   :  { %v1384_v46 = vpop.eup %1383 }
 0x1ff   :  { %v1386_v47 = vpop.eup %1385  ;;  %v1020_v48 = vadd.f32 1.0, %v1384_v46 }
 0x200   :  { %v1018_v49 = vadd.f32 1.0, %v1386_v47 }
 0x201   :  { %1393 = vrcp.f32 %v1020_v48 }
 0x202   :  { %v1388_v50 = vpop.eup %1387  ;;  %1395 = vrcp.f32 %v1018_v49 }
 0x203   :  { %v1390_v63 = vpop.eup %1389  ;;  %v1021_v0 = vadd.f32 1.0, %v1388_v50 }
 0x204   :  { %v1019_v1 = vadd.f32 1.0, %v1390_v63 }
 0x205   :  { %1397 = vrcp.f32 %v1021_v0 }
 0x206   :  { %v1392_v59 = vpop.eup %1391  ;;  %1399 = vrcp.f32 %v1019_v1 }
 0x207   :  { %v1022_v60 = vadd.f32 1.0, %v1392_v59 }
 0x209   :  { %1401 = vrcp.f32 %v1022_v60 }
 0x20e   :  { %v1394_v61 = vpop.eup %1393 }
 0x20f   :  { %v1396_v62 = vpop.eup %1395  ;;  %1036 = vst.msk [vmem:[%s1738_s4 + $0x10] sm:$0xff] %vm1033_vm3, %v1394_v61 }
 0x210   :  { %1034 = vst.msk [vmem:[%s1738_s4] sm:$0xff] %vm1033_vm3, %v1396_v62 }
 0x212   :  { %v1398_v2 = vpop.eup %1397 }
 0x213   :  { %v1400_v3 = vpop.eup %1399  ;;  %1037 = vst.msk [vmem:[%s1738_s4 + $0x18] sm:$0xff] %vm1033_vm3, %v1398_v2 }
 0x214   :  { %1035 = vst.msk [vmem:[%s1738_s4 + $0x8] sm:$0xff] %vm1033_vm3, %v1400_v3 }
 0x216   :  { %v1402_v55 = vpop.eup %1401 }
 0x217   :  { %1038 = vst.msk [vmem:[%s1738_s4 + $0x20] sm:$0xff] %vm1033_vm3, %v1402_v55 }

</bundles_post_ra>
